<compile_context>
chip_gen: v7x
topology: tpu7x:2x2x1
jax: 0.10.0
libtpu: 0.0.40
codegen_flags: <defaults>
</compile_context>

<pallas_src>
import functools

import jax
import jax.numpy as jnp
from jax.experimental import pallas as pl
from jax.experimental.pallas import tpu as pltpu

jax.config.update("jax_default_matmul_precision", "highest")

# ----------------------- scaled-down SMPL-H dimensions -----------------------
BATCH = 2
NUM_VERTS = 256          # real SMPL-H: 6890
NUM_JOINTS = 8           # real SMPL-H: 52
NUM_BETAS = 16           # real: 300
POSE_PARAM_NUM = 3 * NUM_JOINTS          # real: SMPLH_POSE_PARAM_NUM = 152
POSE_FEAT = 9 * (NUM_JOINTS - 1)         # pose-blendshape features (rotmats - I)
PARENTS = (-1, 0, 0, 1, 2, 3, 4, 5)      # synthetic kinematic tree

# Vertex-tile width. 512 keeps double-buffered bf16 shapedirs+posedirs tiles at
# a few MB even at real SMPL-H sizes (safe for v7x's 64 MiB VMEM); v5e/v6e can
# go to 1024.
V_TILE_MAX = 512


def _vertex_tiling(V, max_tile=V_TILE_MAX):
    """Pick a lane-aligned vertex tile and the padded vertex count."""
    Vp = pl.cdiv(V, 128) * 128
    tile = min(max_tile, Vp)
    Vp = pl.cdiv(Vp, tile) * tile
    return tile, Vp


def _pad_last(x, Vp):
    V = x.shape[-1]
    if V == Vp:
        return x
    pad = [(0, 0)] * (x.ndim - 1) + [(0, Vp - V)]
    return jnp.pad(x, pad)


# ------------------------------ Pallas kernel 1 ------------------------------
# shape blendshapes + pose blendshapes + offsets -> naked / tposed (coordinate-major)
def _blendshape_kernel(betas_ref, posefeat_ref, tmpl_ref, shapedirs_ref,
                       posedirs_ref, offsets_ref, naked_ref, tposed_ref):
    betas = betas_ref[...]            # (B, K)   f32
    pfeat = posefeat_ref[...]         # (B, P)   f32
    offs = offsets_ref[...]           # (B, 3, TV) f32
    tmpl = tmpl_ref[...]              # (3, TV)  f32

    naked_rows = []
    tposed_rows = []
    for d in range(3):                # static unroll over x/y/z
        sh = shapedirs_ref[d].astype(jnp.float32)     # (K, TV)  bf16 -> f32
        pdirs = posedirs_ref[d].astype(jnp.float32)   # (P, TV)  bf16 -> f32
        naked_d = (jnp.dot(betas, sh, preferred_element_type=jnp.float32)
                   + tmpl[d:d + 1, :])                               # (B, TV)
        tposed_d = (naked_d + offs[:, d, :]
                    + jnp.dot(pfeat, pdirs, preferred_element_type=jnp.float32))
        naked_rows.append(naked_d)
        tposed_rows.append(tposed_d)

    # single full-block (unmasked) store per output per tile
    naked_ref[...] = jnp.stack(naked_rows, axis=1)    # (B, 3, TV)
    tposed_ref[...] = jnp.stack(tposed_rows, axis=1)  # (B, 3, TV)


def blendshapes(betas, pose_feat, v_template, shapedirs, posedirs, offsets_t):
    B, K = betas.shape
    P = pose_feat.shape[1]
    V = v_template.shape[1]
    tile, Vp = _vertex_tiling(V)
    nv = Vp // tile

    v_template_p = _pad_last(v_template, Vp)
    shapedirs_p = _pad_last(shapedirs, Vp)
    posedirs_p = _pad_last(posedirs, Vp)
    offsets_p = _pad_last(offsets_t, Vp)

    grid_spec = pltpu.PrefetchScalarGridSpec(
        num_scalar_prefetch=0,
        grid=(nv,),
        in_specs=[
            pl.BlockSpec((B, K), lambda i: (0, 0)),
            pl.BlockSpec((B, P), lambda i: (0, 0)),
            pl.BlockSpec((3, tile), lambda i: (0, i)),
            pl.BlockSpec((3, K, tile), lambda i: (0, 0, i)),
            pl.BlockSpec((3, P, tile), lambda i: (0, 0, i)),
            pl.BlockSpec((B, 3, tile), lambda i: (0, 0, i)),
        ],
        out_specs=[
            pl.BlockSpec((B, 3, tile), lambda i: (0, 0, i)),
            pl.BlockSpec((B, 3, tile), lambda i: (0, 0, i)),
        ],
    )
    out_shape = (
        jax.ShapeDtypeStruct((B, 3, Vp), jnp.float32),   # naked
        jax.ShapeDtypeStruct((B, 3, Vp), jnp.float32),   # tposed
    )
    naked_t, tposed_t = pl.pallas_call(
        _blendshape_kernel,
        out_shape=out_shape,
        grid_spec=grid_spec,
        compiler_params=pltpu.CompilerParams(
            dimension_semantics=("parallel",),           # no accumulator -> megacore OK
            vmem_limit_bytes=64 * 1024 * 1024),
    )(betas, pose_feat, v_template_p, shapedirs_p, posedirs_p, offsets_p)
    return naked_t[:, :, :V], tposed_t[:, :, :V]


# ------------------------------ Pallas kernel 2 ------------------------------
# linear blend skinning: per-vertex T = A @ W (one fused MXU matmul for the
# whole batch), then verts = T[:3,:4] * [tposed, 1] + trans.
def _skinning_kernel(A_ref, w_ref, tposed_ref, trans_ref, verts_ref):
    A = A_ref[...]          # (B*16, J) — row-major flattened 4x4 per joint, batch-stacked
    w = w_ref[...]          # (J, TV)
    tp = tposed_ref[...]    # (B, 3, TV)
    tr = trans_ref[...]     # (B, 3)
    T = jnp.dot(A, w, preferred_element_type=jnp.float32)   # (B*16, TV), one MXU push
    B = tp.shape[0]
    rows = []
    for b in range(B):      # static unroll over the (tiny) batch — elementwise only
        base = 16 * b
        vx = tp[b, 0:1, :]
        vy = tp[b, 1:2, :]
        vz = tp[b, 2:3, :]
        ox = (T[base + 0:base + 1] * vx + T[base + 1:base + 2] * vy
              + T[base + 2:base + 3] * vz + T[base + 3:base + 4] + tr[b:b + 1, 0:1])
        oy = (T[base + 4:base + 5] * vx + T[base + 5:base + 6] * vy
              + T[base + 6:base + 7] * vz + T[base + 7:base + 8] + tr[b:b + 1, 1:2])
        oz = (T[base + 8:base + 9] * vx + T[base + 9:base + 10] * vy
              + T[base + 10:base + 11] * vz + T[base + 11:base + 12] + tr[b:b + 1, 2:3])
        rows.append(jnp.concatenate([ox, oy, oz], axis=0))  # (3, TV)
    verts_ref[...] = jnp.stack(rows, axis=0)                # single (B,3,TV) store


def lbs_skinning(A_flat2, lbs_weights_t, tposed_t, trans):
    B, _, V = tposed_t.shape
    J = lbs_weights_t.shape[0]
    tile, Vp = _vertex_tiling(V)
    nv = Vp // tile

    w_p = _pad_last(lbs_weights_t, Vp)
    tp_p = _pad_last(tposed_t, Vp)

    grid_spec = pltpu.PrefetchScalarGridSpec(
        num_scalar_prefetch=0,
        grid=(nv,),
        in_specs=[
            pl.BlockSpec((B * 16, J), lambda i: (0, 0)),
            pl.BlockSpec((J, tile), lambda i: (0, i)),
            pl.BlockSpec((B, 3, tile), lambda i: (0, 0, i)),
            pl.BlockSpec((B, 3), lambda i: (0, 0)),
        ],
        out_specs=pl.BlockSpec((B, 3, tile), lambda i: (0, 0, i)),
    )
    verts_t = pl.pallas_call(
        _skinning_kernel,
        out_shape=jax.ShapeDtypeStruct((B, 3, Vp), jnp.float32),
        grid_spec=grid_spec,
        compiler_params=pltpu.CompilerParams(dimension_semantics=("parallel",)),
    )(A_flat2, w_p, tp_p, trans)
    return verts_t[:, :, :V]


# ------------------------------- JAX glue code --------------------------------
def rodrigues(axisang):
    """axis-angle (..., 3) -> rotation matrices (..., 3, 3)."""
    angle = jnp.sqrt(jnp.sum(axisang * axisang, axis=-1, keepdims=True) + 1e-8)
    axis = axisang / angle
    s = jnp.sin(angle)[..., None]
    c = jnp.cos(angle)[..., None]
    x, y, z = axis[..., 0], axis[..., 1], axis[..., 2]
    zeros = jnp.zeros_like(x)
    K = jnp.stack([zeros, -z, y, z, zeros, -x, -y, x, zeros],
                  axis=-1).reshape(axisang.shape[:-1] + (3, 3))
    eye = jnp.eye(3, dtype=axisang.dtype)
    return eye + s * K + (1.0 - c) * jnp.matmul(K, K)


def rigid_transforms(rotmats, joints_rest, parents):
    """Compose the kinematic chain (tiny sequential 4x4 work -> plain JAX)."""
    B, J = rotmats.shape[0], rotmats.shape[1]
    dtype = rotmats.dtype
    bottom = jnp.tile(jnp.array([[[0.0, 0.0, 0.0, 1.0]]], dtype), (B, 1, 1))

    def make_T(R, t):
        return jnp.concatenate(
            [jnp.concatenate([R, t[:, :, None]], axis=2), bottom], axis=1)

    G = [make_T(rotmats[:, 0], joints_rest[:, 0])]
    for j in range(1, J):
        rel = joints_rest[:, j] - joints_rest[:, parents[j]]
        G.append(jnp.matmul(G[parents[j]], make_T(rotmats[:, j], rel)))
    G = jnp.stack(G, axis=1)                       # (B, J, 4, 4)
    posed_joints = G[:, :, :3, 3]
    corr = jnp.einsum('bjik,bjk->bji', G[:, :, :3, :3], joints_rest)
    A = G.at[:, :, :3, 3].add(-corr)               # "remove rest pose" transforms
    return posed_joints, A


def smplh_forward(params, pose, betas, trans, offsets):
    """Equivalent of th_batch_SMPLH.forward(): returns (verts, jtr, tposed, naked)."""
    B = pose.shape[0]
    J = NUM_JOINTS
    rotmats = rodrigues(pose.reshape(B, J, 3))                           # (B, J, 3, 3)
    pose_feat = (rotmats[:, 1:] - jnp.eye(3, dtype=pose.dtype)).reshape(B, POSE_FEAT)

    offsets_t = jnp.transpose(offsets, (0, 2, 1))                        # (B, 3, V)
    naked_t, tposed_t = blendshapes(
        betas, pose_feat, params['v_template'], params['shapedirs'],
        params['posedirs'], offsets_t)

    # joint regression on the shaped template: tiny (J x V) contraction, hoisted
    # out of kernel 1 so the vertex grid axis stays 'parallel'.
    joints_rest = jnp.einsum('jv,bdv->bjd', params['j_regressor'], naked_t)

    posed_joints, A = rigid_transforms(rotmats, joints_rest, PARENTS)
    # (B, J, 4, 4) -> (B*16, J): one fused MXU matmul per vertex tile in kernel 2
    A_flat2 = jnp.transpose(A.reshape(B, J, 16), (0, 2, 1)).reshape(B * 16, J)

    verts_t = lbs_skinning(A_flat2, params['lbs_weights_t'], tposed_t, trans)

    verts = jnp.transpose(verts_t, (0, 2, 1))                            # (B, V, 3)
    jtr = posed_joints + trans[:, None, :]                               # (B, J, 3)
    tposed = jnp.transpose(tposed_t, (0, 2, 1))
    naked = jnp.transpose(naked_t, (0, 2, 1))
    return verts, jtr, tposed, naked


def reference_forward(params, pose, betas, trans, offsets):
    """Pure-JAX reference for correctness checking (same bf16-rounded blendshapes)."""
    B = pose.shape[0]
    J = NUM_JOINTS
    rotmats = rodrigues(pose.reshape(B, J, 3))
    pose_feat = (rotmats[:, 1:] - jnp.eye(3, dtype=pose.dtype)).reshape(B, POSE_FEAT)

    shapedirs = params['shapedirs'].astype(jnp.float32)
    posedirs = params['posedirs'].astype(jnp.float32)
    naked_t = params['v_template'][None] + jnp.einsum('bk,dkv->bdv', betas, shapedirs)
    joints_rest = jnp.einsum('jv,bdv->bjd', params['j_regressor'], naked_t)
    tposed_t = (naked_t + jnp.transpose(offsets, (0, 2, 1))
                + jnp.einsum('bp,dpv->bdv', pose_feat, posedirs))

    posed_joints, A = rigid_transforms(rotmats, joints_rest, PARENTS)
    T = jnp.einsum('bjrc,jv->bvrc', A, params['lbs_weights_t'])          # (B, V, 4, 4)
    tposed = jnp.transpose(tposed_t, (0, 2, 1))
    vhom = jnp.concatenate([tposed, jnp.ones((B, NUM_VERTS, 1), jnp.float32)], axis=-1)
    verts = jnp.einsum('bvrc,bvc->bvr', T, vhom)[..., :3] + trans[:, None, :]
    jtr = posed_joints + trans[:, None, :]
    naked = jnp.transpose(naked_t, (0, 2, 1))
    return verts, jtr, tposed, naked


def init_smplh_params(key):
    k1, k2, k3, k4, k5 = jax.random.split(key, 5)
    v_template = jax.random.normal(k1, (3, NUM_VERTS), jnp.float32)
    # blendshape directions stored in bf16 (streamed from HBM every call;
    # upcast to f32 inside kernel 1 before the MXU matmuls)
    shapedirs = (0.01 * jax.random.normal(k2, (3, NUM_BETAS, NUM_VERTS), jnp.float32)
                 ).astype(jnp.bfloat16)
    posedirs = (0.001 * jax.random.normal(k3, (3, POSE_FEAT, NUM_VERTS), jnp.float32)
                ).astype(jnp.bfloat16)
    j_regressor = jax.nn.softmax(
        jax.random.normal(k4, (NUM_JOINTS, NUM_VERTS), jnp.float32), axis=-1)
    # LBS weights: columns (per vertex) sum to 1, stored transposed (J, V)
    lbs_weights_t = jax.nn.softmax(
        jax.random.normal(k5, (NUM_JOINTS, NUM_VERTS), jnp.float32), axis=0)
    return dict(v_template=v_template, shapedirs=shapedirs, posedirs=posedirs,
                j_regressor=j_regressor, lbs_weights_t=lbs_weights_t)


if __name__ == "__main__":
    key = jax.random.PRNGKey(0)
    kp, kb, kpos, kt, ko = jax.random.split(key, 5)

    params = init_smplh_params(kp)

    # module parameters (nn.Parameter in th_batch_SMPLH), small deterministic values
    betas = 0.5 * jax.random.normal(kb, (BATCH, NUM_BETAS), jnp.float32)
    pose = 0.2 * jax.random.normal(kpos, (BATCH, POSE_PARAM_NUM), jnp.float32)
    trans = 0.1 * jax.random.normal(kt, (BATCH, 3), jnp.float32)
    offsets = 0.01 * jax.random.normal(ko, (BATCH, NUM_VERTS, 3), jnp.float32)

    fwd = jax.jit(functools.partial(smplh_forward, params))
    verts, jtr, tposed, naked = fwd(pose, betas, trans, offsets)
    jax.block_until_ready((verts, jtr, tposed, naked))

    assert verts.shape == (BATCH, NUM_VERTS, 3)
    assert jtr.shape == (BATCH, NUM_JOINTS, 3)
    assert tposed.shape == (BATCH, NUM_VERTS, 3)
    assert naked.shape == (BATCH, NUM_VERTS, 3)

    ref = reference_forward(params, pose, betas, trans, offsets)
    for got, want in zip((verts, jtr, tposed, naked), ref):
        assert jnp.allclose(got, want, atol=1e-3, rtol=1e-3), "mismatch vs JAX reference"

    print("KERNEL_OK")
</pallas_src>

<mosaic_0001>
module attributes {stable_mosaic.version = 11 : i64} {
  func.func @_blendshape_kernel(%arg0: i32, %arg1: memref<2x16xf32, #tpu.memory_space<vmem>>, %arg2: memref<2x63xf32, #tpu.memory_space<vmem>>, %arg3: memref<3x256xf32, #tpu.memory_space<vmem>>, %arg4: memref<3x16x256xbf16, #tpu.memory_space<vmem>>, %arg5: memref<3x63x256xbf16, #tpu.memory_space<vmem>>, %arg6: memref<2x3x256xf32, #tpu.memory_space<vmem>>, %arg7: memref<2x3x256xf32, #tpu.memory_space<vmem>>, %arg8: memref<2x3x256xf32, #tpu.memory_space<vmem>>) attributes {dimension_semantics = [#tpu.dimension_semantics<parallel>], iteration_bounds = array<i64: 1>, scalar_prefetch = 0 : i64, scratch_operands = 0 : i64, tpu.core_type = #tpu.core_type<tc>, window_params = [{pipeline_mode = #tpu.pipeline_mode<synchronous>, transform_indices = @transform_0, window_bounds = array<i64: 2, 16>}, {pipeline_mode = #tpu.pipeline_mode<synchronous>, transform_indices = @transform_1, window_bounds = array<i64: 2, 63>}, {transform_indices = @transform_2, window_bounds = array<i64: 3, 256>}, {transform_indices = @transform_3, window_bounds = array<i64: 3, 16, 256>}, {transform_indices = @transform_4, window_bounds = array<i64: 3, 63, 256>}, {transform_indices = @transform_5, window_bounds = array<i64: 2, 3, 256>}, {transform_indices = @transform_6, window_bounds = array<i64: 2, 3, 256>}, {transform_indices = @transform_7, window_bounds = array<i64: 2, 3, 256>}]} {
    %c0 = arith.constant 0 : index
    %c0_0 = arith.constant 0 : index
    %0 = vector.load %arg1[%c0, %c0_0] : memref<2x16xf32, #tpu.memory_space<vmem>>, vector<2x16xf32>
    %c0_1 = arith.constant 0 : index
    %c0_2 = arith.constant 0 : index
    %1 = vector.load %arg2[%c0_1, %c0_2] : memref<2x63xf32, #tpu.memory_space<vmem>>, vector<2x63xf32>
    %c0_3 = arith.constant 0 : index
    %c0_4 = arith.constant 0 : index
    %c0_5 = arith.constant 0 : index
    %2 = vector.load %arg6[%c0_3, %c0_4, %c0_5] : memref<2x3x256xf32, #tpu.memory_space<vmem>>, vector<2x3x256xf32>
    %c0_6 = arith.constant 0 : index
    %c0_7 = arith.constant 0 : index
    %3 = vector.load %arg3[%c0_6, %c0_7] : memref<3x256xf32, #tpu.memory_space<vmem>>, vector<3x256xf32>
    %c0_8 = arith.constant 0 : index
    %c0_9 = arith.constant 0 : index
    %c0_10 = arith.constant 0 : index
    %4 = vector.load %arg4[%c0_8, %c0_9, %c0_10] : memref<3x16x256xbf16, #tpu.memory_space<vmem>>, vector<1x16x256xbf16>
    %5 = vector.shape_cast %4 : vector<1x16x256xbf16> to vector<16x256xbf16>
    %6 = arith.extf %5 : vector<16x256xbf16> to vector<16x256xf32>
    %c0_11 = arith.constant 0 : index
    %c0_12 = arith.constant 0 : index
    %c0_13 = arith.constant 0 : index
    %7 = vector.load %arg5[%c0_11, %c0_12, %c0_13] : memref<3x63x256xbf16, #tpu.memory_space<vmem>>, vector<1x63x256xbf16>
    %8 = vector.shape_cast %7 : vector<1x63x256xbf16> to vector<63x256xbf16>
    %9 = arith.extf %8 : vector<63x256xbf16> to vector<63x256xf32>
    %cst = arith.constant dense<0.000000e+00> : vector<2x256xf32>
    %10 = tpu.matmul %0, %6, %cst {dimension_numbers = #tpu.dot_dimension_numbers<[1], [0], [0], [1], [0, 0, 1, 1], [], []>, precision = #tpu.contract_precision<fp32>} : vector<2x16xf32>, vector<16x256xf32>, vector<2x256xf32> -> vector<2x256xf32>
    %11 = vector.extract_strided_slice %3 {offsets = [0, 0], sizes = [1, 256], strides = [1, 1]} : vector<3x256xf32> to vector<1x256xf32>
    %12 = vector.broadcast %11 : vector<1x256xf32> to vector<2x256xf32>
    %13 = arith.addf %10, %12 : vector<2x256xf32>
    %14 = vector.extract_strided_slice %2 {offsets = [0, 0, 0], sizes = [2, 1, 256], strides = [1, 1, 1]} : vector<2x3x256xf32> to vector<2x1x256xf32>
    %15 = vector.shape_cast %14 : vector<2x1x256xf32> to vector<2x256xf32>
    %16 = arith.addf %13, %15 : vector<2x256xf32>
    %cst_14 = arith.constant dense<0.000000e+00> : vector<2x256xf32>
    %17 = tpu.matmul %1, %9, %cst_14 {dimension_numbers = #tpu.dot_dimension_numbers<[1], [0], [0], [1], [0, 0, 1, 1], [], []>, precision = #tpu.contract_precision<fp32>} : vector<2x63xf32>, vector<63x256xf32>, vector<2x256xf32> -> vector<2x256xf32>
    %18 = arith.addf %16, %17 : vector<2x256xf32>
    %c1 = arith.constant 1 : index
    %c0_15 = arith.constant 0 : index
    %c0_16 = arith.constant 0 : index
    %19 = vector.load %arg4[%c1, %c0_15, %c0_16] : memref<3x16x256xbf16, #tpu.memory_space<vmem>>, vector<1x16x256xbf16>
    %20 = vector.shape_cast %19 : vector<1x16x256xbf16> to vector<16x256xbf16>
    %21 = arith.extf %20 : vector<16x256xbf16> to vector<16x256xf32>
    %c1_17 = arith.constant 1 : index
    %c0_18 = arith.constant 0 : index
    %c0_19 = arith.constant 0 : index
    %22 = vector.load %arg5[%c1_17, %c0_18, %c0_19] : memref<3x63x256xbf16, #tpu.memory_space<vmem>>, vector<1x63x256xbf16>
    %23 = vector.shape_cast %22 : vector<1x63x256xbf16> to vector<63x256xbf16>
    %24 = arith.extf %23 : vector<63x256xbf16> to vector<63x256xf32>
    %cst_20 = arith.constant dense<0.000000e+00> : vector<2x256xf32>
    %25 = tpu.matmul %0, %21, %cst_20 {dimension_numbers = #tpu.dot_dimension_numbers<[1], [0], [0], [1], [0, 0, 1, 1], [], []>, precision = #tpu.contract_precision<fp32>} : vector<2x16xf32>, vector<16x256xf32>, vector<2x256xf32> -> vector<2x256xf32>
    %26 = vector.extract_strided_slice %3 {offsets = [1, 0], sizes = [1, 256], strides = [1, 1]} : vector<3x256xf32> to vector<1x256xf32>
    %27 = vector.broadcast %26 : vector<1x256xf32> to vector<2x256xf32>
    %28 = arith.addf %25, %27 : vector<2x256xf32>
    %29 = vector.extract_strided_slice %2 {offsets = [0, 1, 0], sizes = [2, 1, 256], strides = [1, 1, 1]} : vector<2x3x256xf32> to vector<2x1x256xf32>
    %30 = vector.shape_cast %29 : vector<2x1x256xf32> to vector<2x256xf32>
    %31 = arith.addf %28, %30 : vector<2x256xf32>
    %cst_21 = arith.constant dense<0.000000e+00> : vector<2x256xf32>
    %32 = tpu.matmul %1, %24, %cst_21 {dimension_numbers = #tpu.dot_dimension_numbers<[1], [0], [0], [1], [0, 0, 1, 1], [], []>, precision = #tpu.contract_precision<fp32>} : vector<2x63xf32>, vector<63x256xf32>, vector<2x256xf32> -> vector<2x256xf32>
    %33 = arith.addf %31, %32 : vector<2x256xf32>
    %c2 = arith.constant 2 : index
    %c0_22 = arith.constant 0 : index
    %c0_23 = arith.constant 0 : index
    %34 = vector.load %arg4[%c2, %c0_22, %c0_23] : memref<3x16x256xbf16, #tpu.memory_space<vmem>>, vector<1x16x256xbf16>
    %35 = vector.shape_cast %34 : vector<1x16x256xbf16> to vector<16x256xbf16>
    %36 = arith.extf %35 : vector<16x256xbf16> to vector<16x256xf32>
    %c2_24 = arith.constant 2 : index
    %c0_25 = arith.constant 0 : index
    %c0_26 = arith.constant 0 : index
    %37 = vector.load %arg5[%c2_24, %c0_25, %c0_26] : memref<3x63x256xbf16, #tpu.memory_space<vmem>>, vector<1x63x256xbf16>
    %38 = vector.shape_cast %37 : vector<1x63x256xbf16> to vector<63x256xbf16>
    %39 = arith.extf %38 : vector<63x256xbf16> to vector<63x256xf32>
    %cst_27 = arith.constant dense<0.000000e+00> : vector<2x256xf32>
    %40 = tpu.matmul %0, %36, %cst_27 {dimension_numbers = #tpu.dot_dimension_numbers<[1], [0], [0], [1], [0, 0, 1, 1], [], []>, precision = #tpu.contract_precision<fp32>} : vector<2x16xf32>, vector<16x256xf32>, vector<2x256xf32> -> vector<2x256xf32>
    %41 = vector.extract_strided_slice %3 {offsets = [2, 0], sizes = [1, 256], strides = [1, 1]} : vector<3x256xf32> to vector<1x256xf32>
    %42 = vector.broadcast %41 : vector<1x256xf32> to vector<2x256xf32>
    %43 = arith.addf %40, %42 : vector<2x256xf32>
    %44 = vector.extract_strided_slice %2 {offsets = [0, 2, 0], sizes = [2, 1, 256], strides = [1, 1, 1]} : vector<2x3x256xf32> to vector<2x1x256xf32>
    %45 = vector.shape_cast %44 : vector<2x1x256xf32> to vector<2x256xf32>
    %46 = arith.addf %43, %45 : vector<2x256xf32>
    %cst_28 = arith.constant dense<0.000000e+00> : vector<2x256xf32>
    %47 = tpu.matmul %1, %39, %cst_28 {dimension_numbers = #tpu.dot_dimension_numbers<[1], [0], [0], [1], [0, 0, 1, 1], [], []>, precision = #tpu.contract_precision<fp32>} : vector<2x63xf32>, vector<63x256xf32>, vector<2x256xf32> -> vector<2x256xf32>
    %48 = arith.addf %46, %47 : vector<2x256xf32>
    %49 = vector.shape_cast %13 : vector<2x256xf32> to vector<2x1x256xf32>
    %50 = vector.shape_cast %28 : vector<2x256xf32> to vector<2x1x256xf32>
    %51 = vector.shape_cast %43 : vector<2x256xf32> to vector<2x1x256xf32>
    %52 = tpu.concatenate %49, %50, %51 in 1 : vector<2x1x256xf32>, vector<2x1x256xf32>, vector<2x1x256xf32> -> vector<2x3x256xf32>
    %c0_29 = arith.constant 0 : index
    %c0_30 = arith.constant 0 : index
    %c0_31 = arith.constant 0 : index
    %53 = vector.load %arg7[%c0_29, %c0_30, %c0_31] : memref<2x3x256xf32, #tpu.memory_space<vmem>>, vector<2x3x256xf32>
    tpu.vector_store %arg7[%c0_29, %c0_30, %c0_31], %52 {strides = array<i32>} : memref<2x3x256xf32, #tpu.memory_space<vmem>>, vector<2x3x256xf32>,
    %54 = vector.shape_cast %18 : vector<2x256xf32> to vector<2x1x256xf32>
    %55 = vector.shape_cast %33 : vector<2x256xf32> to vector<2x1x256xf32>
    %56 = vector.shape_cast %48 : vector<2x256xf32> to vector<2x1x256xf32>
    %57 = tpu.concatenate %54, %55, %56 in 1 : vector<2x1x256xf32>, vector<2x1x256xf32>, vector<2x1x256xf32> -> vector<2x3x256xf32>
    %c0_32 = arith.constant 0 : index
    %c0_33 = arith.constant 0 : index
    %c0_34 = arith.constant 0 : index
    %58 = vector.load %arg8[%c0_32, %c0_33, %c0_34] : memref<2x3x256xf32, #tpu.memory_space<vmem>>, vector<2x3x256xf32>
    tpu.vector_store %arg8[%c0_32, %c0_33, %c0_34], %57 {strides = array<i32>} : memref<2x3x256xf32, #tpu.memory_space<vmem>>, vector<2x3x256xf32>,
    return
  }
  func.func @transform_0(%arg0: i32) -> (i32, i32) {
    %c0_i32 = arith.constant 0 : i32
    %c0_i32_0 = arith.constant 0 : i32
    %c0_i32_1 = arith.constant 0 : i32
    return %c0_i32, %c0_i32_0 : i32, i32
  }
  func.func @transform_1(%arg0: i32) -> (i32, i32) {
    %c0_i32 = arith.constant 0 : i32
    %c0_i32_0 = arith.constant 0 : i32
    %c0_i32_1 = arith.constant 0 : i32
    return %c0_i32, %c0_i32_0 : i32, i32
  }
  func.func @transform_2(%arg0: i32) -> (i32, i32) {
    %c0_i32 = arith.constant 0 : i32
    %c0_i32_0 = arith.constant 0 : i32
    return %c0_i32, %arg0 : i32, i32
  }
  func.func @transform_3(%arg0: i32) -> (i32, i32, i32) {
    %c0_i32 = arith.constant 0 : i32
    %c0_i32_0 = arith.constant 0 : i32
    %c0_i32_1 = arith.constant 0 : i32
    return %c0_i32, %c0_i32_0, %arg0 : i32, i32, i32
  }
  func.func @transform_4(%arg0: i32) -> (i32, i32, i32) {
    %c0_i32 = arith.constant 0 : i32
    %c0_i32_0 = arith.constant 0 : i32
    %c0_i32_1 = arith.constant 0 : i32
    return %c0_i32, %c0_i32_0, %arg0 : i32, i32, i32
  }
  func.func @transform_5(%arg0: i32) -> (i32, i32, i32) {
    %c0_i32 = arith.constant 0 : i32
    %c0_i32_0 = arith.constant 0 : i32
    %c0_i32_1 = arith.constant 0 : i32
    return %c0_i32, %c0_i32_0, %arg0 : i32, i32, i32
  }
  func.func @transform_6(%arg0: i32) -> (i32, i32, i32) {
    %c0_i32 = arith.constant 0 : i32
    %c0_i32_0 = arith.constant 0 : i32
    %c0_i32_1 = arith.constant 0 : i32
    return %c0_i32, %c0_i32_0, %arg0 : i32, i32, i32
  }
  func.func @transform_7(%arg0: i32) -> (i32, i32, i32) {
    %c0_i32 = arith.constant 0 : i32
    %c0_i32_0 = arith.constant 0 : i32
    %c0_i32_1 = arith.constant 0 : i32
    return %c0_i32, %c0_i32_0, %arg0 : i32, i32, i32
  }
}

module attributes {stable_mosaic.version = 11 : i64} {
  func.func @_skinning_kernel(%arg0: i32, %arg1: memref<32x8xf32, #tpu.memory_space<vmem>>, %arg2: memref<8x256xf32, #tpu.memory_space<vmem>>, %arg3: memref<2x3x256xf32, #tpu.memory_space<vmem>>, %arg4: memref<2x3xf32, #tpu.memory_space<vmem>>, %arg5: memref<2x3x256xf32, #tpu.memory_space<vmem>>) attributes {dimension_semantics = [#tpu.dimension_semantics<parallel>], iteration_bounds = array<i64: 1>, scalar_prefetch = 0 : i64, scratch_operands = 0 : i64, tpu.core_type = #tpu.core_type<tc>, window_params = [{pipeline_mode = #tpu.pipeline_mode<synchronous>, transform_indices = @transform_0, window_bounds = array<i64: 32, 8>}, {transform_indices = @transform_1, window_bounds = array<i64: 8, 256>}, {transform_indices = @transform_2, window_bounds = array<i64: 2, 3, 256>}, {pipeline_mode = #tpu.pipeline_mode<synchronous>, transform_indices = @transform_3, window_bounds = array<i64: 2, 3>}, {transform_indices = @transform_4, window_bounds = array<i64: 2, 3, 256>}]} {
    %c0 = arith.constant 0 : index
    %c0_0 = arith.constant 0 : index
    %0 = vector.load %arg1[%c0, %c0_0] : memref<32x8xf32, #tpu.memory_space<vmem>>, vector<32x8xf32>
    %c0_1 = arith.constant 0 : index
    %c0_2 = arith.constant 0 : index
    %1 = vector.load %arg2[%c0_1, %c0_2] : memref<8x256xf32, #tpu.memory_space<vmem>>, vector<8x256xf32>
    %c0_3 = arith.constant 0 : index
    %c0_4 = arith.constant 0 : index
    %c0_5 = arith.constant 0 : index
    %2 = vector.load %arg3[%c0_3, %c0_4, %c0_5] : memref<2x3x256xf32, #tpu.memory_space<vmem>>, vector<2x3x256xf32>
    %c0_6 = arith.constant 0 : index
    %c0_7 = arith.constant 0 : index
    %3 = vector.load %arg4[%c0_6, %c0_7] : memref<2x3xf32, #tpu.memory_space<vmem>>, vector<2x3xf32>
    %cst = arith.constant dense<0.000000e+00> : vector<32x256xf32>
    %4 = tpu.matmul %0, %1, %cst {dimension_numbers = #tpu.dot_dimension_numbers<[1], [0], [0], [1], [0, 0, 1, 1], [], []>, precision = #tpu.contract_precision<fp32>} : vector<32x8xf32>, vector<8x256xf32>, vector<32x256xf32> -> vector<32x256xf32>
    %5 = vector.extract_strided_slice %2 {offsets = [0, 0, 0], sizes = [1, 1, 256], strides = [1, 1, 1]} : vector<2x3x256xf32> to vector<1x1x256xf32>
    %6 = vector.shape_cast %5 : vector<1x1x256xf32> to vector<1x256xf32>
    %7 = vector.extract_strided_slice %2 {offsets = [0, 1, 0], sizes = [1, 1, 256], strides = [1, 1, 1]} : vector<2x3x256xf32> to vector<1x1x256xf32>
    %8 = vector.shape_cast %7 : vector<1x1x256xf32> to vector<1x256xf32>
    %9 = vector.extract_strided_slice %2 {offsets = [0, 2, 0], sizes = [1, 1, 256], strides = [1, 1, 1]} : vector<2x3x256xf32> to vector<1x1x256xf32>
    %10 = vector.shape_cast %9 : vector<1x1x256xf32> to vector<1x256xf32>
    %11 = vector.extract_strided_slice %4 {offsets = [0, 0], sizes = [1, 256], strides = [1, 1]} : vector<32x256xf32> to vector<1x256xf32>
    %12 = arith.mulf %11, %6 : vector<1x256xf32>
    %13 = vector.extract_strided_slice %4 {offsets = [1, 0], sizes = [1, 256], strides = [1, 1]} : vector<32x256xf32> to vector<1x256xf32>
    %14 = arith.mulf %13, %8 : vector<1x256xf32>
    %15 = arith.addf %12, %14 : vector<1x256xf32>
    %16 = vector.extract_strided_slice %4 {offsets = [2, 0], sizes = [1, 256], strides = [1, 1]} : vector<32x256xf32> to vector<1x256xf32>
    %17 = arith.mulf %16, %10 : vector<1x256xf32>
    %18 = arith.addf %15, %17 : vector<1x256xf32>
    %19 = vector.extract_strided_slice %4 {offsets = [3, 0], sizes = [1, 256], strides = [1, 1]} : vector<32x256xf32> to vector<1x256xf32>
    %20 = arith.addf %18, %19 : vector<1x256xf32>
    %21 = vector.extract_strided_slice %3 {offsets = [0, 0], sizes = [1, 1], strides = [1, 1]} : vector<2x3xf32> to vector<1x1xf32>
    %22 = vector.broadcast %21 : vector<1x1xf32> to vector<1x256xf32>
    %23 = arith.addf %20, %22 : vector<1x256xf32>
    %24 = vector.extract_strided_slice %4 {offsets = [4, 0], sizes = [1, 256], strides = [1, 1]} : vector<32x256xf32> to vector<1x256xf32>
    %25 = arith.mulf %24, %6 : vector<1x256xf32>
    %26 = vector.extract_strided_slice %4 {offsets = [5, 0], sizes = [1, 256], strides = [1, 1]} : vector<32x256xf32> to vector<1x256xf32>
    %27 = arith.mulf %26, %8 : vector<1x256xf32>
    %28 = arith.addf %25, %27 : vector<1x256xf32>
    %29 = vector.extract_strided_slice %4 {offsets = [6, 0], sizes = [1, 256], strides = [1, 1]} : vector<32x256xf32> to vector<1x256xf32>
    %30 = arith.mulf %29, %10 : vector<1x256xf32>
    %31 = arith.addf %28, %30 : vector<1x256xf32>
    %32 = vector.extract_strided_slice %4 {offsets = [7, 0], sizes = [1, 256], strides = [1, 1]} : vector<32x256xf32> to vector<1x256xf32>
    %33 = arith.addf %31, %32 : vector<1x256xf32>
    %34 = vector.extract_strided_slice %3 {offsets = [0, 1], sizes = [1, 1], strides = [1, 1]} : vector<2x3xf32> to vector<1x1xf32>
    %35 = vector.broadcast %34 : vector<1x1xf32> to vector<1x256xf32>
    %36 = arith.addf %33, %35 : vector<1x256xf32>
    %37 = vector.extract_strided_slice %4 {offsets = [8, 0], sizes = [1, 256], strides = [1, 1]} : vector<32x256xf32> to vector<1x256xf32>
    %38 = arith.mulf %37, %6 : vector<1x256xf32>
    %39 = vector.extract_strided_slice %4 {offsets = [9, 0], sizes = [1, 256], strides = [1, 1]} : vector<32x256xf32> to vector<1x256xf32>
    %40 = arith.mulf %39, %8 : vector<1x256xf32>
    %41 = arith.addf %38, %40 : vector<1x256xf32>
    %42 = vector.extract_strided_slice %4 {offsets = [10, 0], sizes = [1, 256], strides = [1, 1]} : vector<32x256xf32> to vector<1x256xf32>
    %43 = arith.mulf %42, %10 : vector<1x256xf32>
    %44 = arith.addf %41, %43 : vector<1x256xf32>
    %45 = vector.extract_strided_slice %4 {offsets = [11, 0], sizes = [1, 256], strides = [1, 1]} : vector<32x256xf32> to vector<1x256xf32>
    %46 = arith.addf %44, %45 : vector<1x256xf32>
    %47 = vector.extract_strided_slice %3 {offsets = [0, 2], sizes = [1, 1], strides = [1, 1]} : vector<2x3xf32> to vector<1x1xf32>
    %48 = vector.broadcast %47 : vector<1x1xf32> to vector<1x256xf32>
    %49 = arith.addf %46, %48 : vector<1x256xf32>
    %50 = tpu.concatenate %23, %36, %49 in 0 : vector<1x256xf32>, vector<1x256xf32>, vector<1x256xf32> -> vector<3x256xf32>
    %51 = vector.extract_strided_slice %2 {offsets = [1, 0, 0], sizes = [1, 1, 256], strides = [1, 1, 1]} : vector<2x3x256xf32> to vector<1x1x256xf32>
    %52 = vector.shape_cast %51 : vector<1x1x256xf32> to vector<1x256xf32>
    %53 = vector.extract_strided_slice %2 {offsets = [1, 1, 0], sizes = [1, 1, 256], strides = [1, 1, 1]} : vector<2x3x256xf32> to vector<1x1x256xf32>
    %54 = vector.shape_cast %53 : vector<1x1x256xf32> to vector<1x256xf32>
    %55 = vector.extract_strided_slice %2 {offsets = [1, 2, 0], sizes = [1, 1, 256], strides = [1, 1, 1]} : vector<2x3x256xf32> to vector<1x1x256xf32>
    %56 = vector.shape_cast %55 : vector<1x1x256xf32> to vector<1x256xf32>
    %57 = vector.extract_strided_slice %4 {offsets = [16, 0], sizes = [1, 256], strides = [1, 1]} : vector<32x256xf32> to vector<1x256xf32>
    %58 = arith.mulf %57, %52 : vector<1x256xf32>
    %59 = vector.extract_strided_slice %4 {offsets = [17, 0], sizes = [1, 256], strides = [1, 1]} : vector<32x256xf32> to vector<1x256xf32>
    %60 = arith.mulf %59, %54 : vector<1x256xf32>
    %61 = arith.addf %58, %60 : vector<1x256xf32>
    %62 = vector.extract_strided_slice %4 {offsets = [18, 0], sizes = [1, 256], strides = [1, 1]} : vector<32x256xf32> to vector<1x256xf32>
    %63 = arith.mulf %62, %56 : vector<1x256xf32>
    %64 = arith.addf %61, %63 : vector<1x256xf32>
    %65 = vector.extract_strided_slice %4 {offsets = [19, 0], sizes = [1, 256], strides = [1, 1]} : vector<32x256xf32> to vector<1x256xf32>
    %66 = arith.addf %64, %65 : vector<1x256xf32>
    %67 = vector.extract_strided_slice %3 {offsets = [1, 0], sizes = [1, 1], strides = [1, 1]} : vector<2x3xf32> to vector<1x1xf32>
    %68 = vector.broadcast %67 : vector<1x1xf32> to vector<1x256xf32>
    %69 = arith.addf %66, %68 : vector<1x256xf32>
    %70 = vector.extract_strided_slice %4 {offsets = [20, 0], sizes = [1, 256], strides = [1, 1]} : vector<32x256xf32> to vector<1x256xf32>
    %71 = arith.mulf %70, %52 : vector<1x256xf32>
    %72 = vector.extract_strided_slice %4 {offsets = [21, 0], sizes = [1, 256], strides = [1, 1]} : vector<32x256xf32> to vector<1x256xf32>
    %73 = arith.mulf %72, %54 : vector<1x256xf32>
    %74 = arith.addf %71, %73 : vector<1x256xf32>
    %75 = vector.extract_strided_slice %4 {offsets = [22, 0], sizes = [1, 256], strides = [1, 1]} : vector<32x256xf32> to vector<1x256xf32>
    %76 = arith.mulf %75, %56 : vector<1x256xf32>
    %77 = arith.addf %74, %76 : vector<1x256xf32>
    %78 = vector.extract_strided_slice %4 {offsets = [23, 0], sizes = [1, 256], strides = [1, 1]} : vector<32x256xf32> to vector<1x256xf32>
    %79 = arith.addf %77, %78 : vector<1x256xf32>
    %80 = vector.extract_strided_slice %3 {offsets = [1, 1], sizes = [1, 1], strides = [1, 1]} : vector<2x3xf32> to vector<1x1xf32>
    %81 = vector.broadcast %80 : vector<1x1xf32> to vector<1x256xf32>
    %82 = arith.addf %79, %81 : vector<1x256xf32>
    %83 = vector.extract_strided_slice %4 {offsets = [24, 0], sizes = [1, 256], strides = [1, 1]} : vector<32x256xf32> to vector<1x256xf32>
    %84 = arith.mulf %83, %52 : vector<1x256xf32>
    %85 = vector.extract_strided_slice %4 {offsets = [25, 0], sizes = [1, 256], strides = [1, 1]} : vector<32x256xf32> to vector<1x256xf32>
    %86 = arith.mulf %85, %54 : vector<1x256xf32>
    %87 = arith.addf %84, %86 : vector<1x256xf32>
    %88 = vector.extract_strided_slice %4 {offsets = [26, 0], sizes = [1, 256], strides = [1, 1]} : vector<32x256xf32> to vector<1x256xf32>
    %89 = arith.mulf %88, %56 : vector<1x256xf32>
    %90 = arith.addf %87, %89 : vector<1x256xf32>
    %91 = vector.extract_strided_slice %4 {offsets = [27, 0], sizes = [1, 256], strides = [1, 1]} : vector<32x256xf32> to vector<1x256xf32>
    %92 = arith.addf %90, %91 : vector<1x256xf32>
    %93 = vector.extract_strided_slice %3 {offsets = [1, 2], sizes = [1, 1], strides = [1, 1]} : vector<2x3xf32> to vector<1x1xf32>
    %94 = vector.broadcast %93 : vector<1x1xf32> to vector<1x256xf32>
    %95 = arith.addf %92, %94 : vector<1x256xf32>
    %96 = tpu.concatenate %69, %82, %95 in 0 : vector<1x256xf32>, vector<1x256xf32>, vector<1x256xf32> -> vector<3x256xf32>
    %97 = vector.shape_cast %50 : vector<3x256xf32> to vector<1x3x256xf32>
    %98 = vector.shape_cast %96 : vector<3x256xf32> to vector<1x3x256xf32>
    %99 = tpu.concatenate %97, %98 in 0 : vector<1x3x256xf32>, vector<1x3x256xf32> -> vector<2x3x256xf32>
    %c0_8 = arith.constant 0 : index
    %c0_9 = arith.constant 0 : index
    %c0_10 = arith.constant 0 : index
    %100 = vector.load %arg5[%c0_8, %c0_9, %c0_10] : memref<2x3x256xf32, #tpu.memory_space<vmem>>, vector<2x3x256xf32>
    tpu.vector_store %arg5[%c0_8, %c0_9, %c0_10], %99 {strides = array<i32>} : memref<2x3x256xf32, #tpu.memory_space<vmem>>, vector<2x3x256xf32>,
    return
  }
  func.func @transform_0(%arg0: i32) -> (i32, i32) {
    %c0_i32 = arith.constant 0 : i32
    %c0_i32_0 = arith.constant 0 : i32
    %c0_i32_1 = arith.constant 0 : i32
    return %c0_i32, %c0_i32_0 : i32, i32
  }
  func.func @transform_1(%arg0: i32) -> (i32, i32) {
    %c0_i32 = arith.constant 0 : i32
    %c0_i32_0 = arith.constant 0 : i32
    return %c0_i32, %arg0 : i32, i32
  }
  func.func @transform_2(%arg0: i32) -> (i32, i32, i32) {
    %c0_i32 = arith.constant 0 : i32
    %c0_i32_0 = arith.constant 0 : i32
    %c0_i32_1 = arith.constant 0 : i32
    return %c0_i32, %c0_i32_0, %arg0 : i32, i32, i32
  }
  func.func @transform_3(%arg0: i32) -> (i32, i32) {
    %c0_i32 = arith.constant 0 : i32
    %c0_i32_0 = arith.constant 0 : i32
    %c0_i32_1 = arith.constant 0 : i32
    return %c0_i32, %c0_i32_0 : i32, i32
  }
  func.func @transform_4(%arg0: i32) -> (i32, i32, i32) {
    %c0_i32 = arith.constant 0 : i32
    %c0_i32_0 = arith.constant 0 : i32
    %c0_i32_1 = arith.constant 0 : i32
    return %c0_i32, %c0_i32_0, %arg0 : i32, i32, i32
  }
}

</mosaic_0001>

<bundles_post_ra>
// kernel: smplh_forward.2
= control target key start
LH: loop header
LB: loop body
LE: loop exit
PB: predicated region body
PF: predicated region fallthrough
CT: control target
= control target key end

     0   :  { %13 = vsyncpa [#allocation3], 0  ;;  %s5856_s0 = inlined_call_operand.hbm [shape: f32[2,16], index: 0, kind: input, shape index: {}]   ;;  %s5857_s1 = inlined_call_operand.hbm [shape: f32[2,63], index: 1, kind: input, shape index: {}]   ;;  %s5858_s2 = inlined_call_operand.hbm [shape: f32[3,256], index: 2, kind: input, shape index: {}]   ;;  %s5859_s3 = inlined_call_operand.hbm [shape: bf16[3,16,256], index: 3, kind: input, shape index: {}]   ;;  %s5860_s4 = inlined_call_operand.hbm [shape: bf16[3,63,256], index: 4, kind: input, shape index: {}]   ;;  %s5861_s5 = inlined_call_operand.hbm [shape: f32[2,3,256], index: 5, kind: input, shape index: {}]   ;;  %s5862_s6 = inlined_call_operand.hbm [shape: f32[2,3,256], index: 6, kind: output, shape index: {0}]   ;;  %s5863_s7 = inlined_call_operand.hbm [shape: f32[2,3,256], index: 7, kind: output, shape index: {1}]  }
   0x1   :  { %14 = vsyncpa [#allocation6], 0 }
   0x2   :  { %15 = vsyncpa [#allocation9], 0 }
   0x3   :  { %16 = vsyncpa [#allocation12], 0 }
   0x4   :  { %17 = vsyncpa [#allocation4], 0 }
   0x5   :  { %18 = vsyncpa [#allocation15], 0  ;;  %s4576_s24 = smov [#allocation5]   ;;  %s4577_s26 = smov [#allocation8]  }
   0x6   :  { %s35_s25 = sshll.u32 %s4576_s24, 4  ;;  %s54_s27 = sshll.u32 %s4577_s26, 4  ;;  %s36_s25 = int_to_ptr.vmem [resolvable:$true] %s35_s25  ;;  %s4629_s27 = int_to_ptr.vmem [resolvable:$true] %s54_s27 }
   0x7   :  { %s4388_s30 = scalar_lea.hbm %s5857_s1, 32 }
   0x8   :  { %p4389_p0 = scmp.ne.s32.totalorder %s5857_s1, %s4388_s30  ;;  %p4392_p1 = scmp.lt.u32.totalorder %s4388_s30, %s5857_s1 }
   0xa   :  { %p4394_p2 = pnand %p4392_p1, %p4389_p0 }
   0xc   :  { %4397 = shalt.err (!%p4394_p2)
}
   0xd   :  { %s4398_s12 = scalar_lea.vmem %s36_s25, 32  ;;  %p4403_p4 = scmp.lt.s32.totalorder %s36_s25, %s36_s25 }
   0xe   :  { %p4399_p3 = scmp.ne.s32.totalorder %s36_s25, %s4398_s12  ;;  %p4404_p5 = scmp.lt.s32.totalorder %s4398_s12, %s4398_s12 }
  0x10   :  { %p4405_p6 = por %p4404_p5, %p4403_p4 }
  0x12   :  { %p4406_p7 = pnand %p4405_p6, %p4399_p3 }
  0x14   :  { %4409 = shalt.err (!%p4406_p7)
}
  0x15   :  { %38 = dma.hbm_to_vmem [thread:$0]  %s5857_s1, 32, %s36_s25, [#allocation6]  }
  0x16   :  { %s4410_s17 = scalar_lea.hbm %s5859_s3, 768 }
  0x17   :  { %p4411_p8 = scmp.ne.s32.totalorder %s5859_s3, %s4410_s17  ;;  %p4414_p9 = scmp.lt.u32.totalorder %s4410_s17, %s5859_s3 }
  0x19   :  { %p4416_p10 = pnand %p4414_p9, %p4411_p8 }
  0x1b   :  { %4419 = shalt.err (!%p4416_p10)
}
  0x1c   :  { %s4420_s22 = scalar_lea.vmem %s4629_s27, 768  ;;  %p4425_p12 = scmp.lt.s32.totalorder %s4629_s27, %s4629_s27 }
  0x1d   :  { %p4421_p11 = scmp.ne.s32.totalorder %s4629_s27, %s4420_s22  ;;  %p4426_p13 = scmp.lt.s32.totalorder %s4420_s22, %s4420_s22 }
  0x1f   :  { %p4427_p0 = por %p4426_p13, %p4425_p12 }
  0x21   :  { %p4428_p1 = pnand %p4427_p0, %p4421_p11 }
  0x23   :  { %4431 = shalt.err (!%p4428_p1)
}
  0x24   :  { %s4578_s1 = smov 128   ;;  %s4579_s23 = smov 8  }
  0x25   :  { %60 = dma.hbm_to_vmem [thread:$0]  %s5859_s3, 768, %s4629_s27, [#allocation9], %s4578_s1, %s4578_s1, %s4579_s23  }
  0x26   :  { %s4580_s26 = smov [#allocation2]   ;;  %s4581_s29 = smov [#allocation7]  }
  0x27   :  { %s25_s28 = sshll.u32 %s4580_s26, 4  ;;  %s45_s30 = sshll.u32 %s4581_s29, 4  ;;  %s26_s28 = int_to_ptr.vmem [resolvable:$true] %s25_s28  ;;  %s46_s30 = int_to_ptr.vmem [resolvable:$true] %s45_s30 }
  0x28   :  { %s4432_s10 = scalar_lea.hbm %s5856_s0, 32 }
  0x29   :  { %p4433_p2 = scmp.ne.s32.totalorder %s5856_s0, %s4432_s10  ;;  %p4436_p3 = scmp.lt.u32.totalorder %s4432_s10, %s5856_s0 }
  0x2b   :  { %p4438_p4 = pnand %p4436_p3, %p4433_p2 }
  0x2d   :  { %4441 = shalt.err (!%p4438_p4)
}
  0x2e   :  { %s4442_s3 = scalar_lea.vmem %s26_s28, 32  ;;  %p4447_p6 = scmp.lt.s32.totalorder %s26_s28, %s26_s28 }
  0x2f   :  { %p4443_p5 = scmp.ne.s32.totalorder %s26_s28, %s4442_s3  ;;  %p4448_p7 = scmp.lt.s32.totalorder %s4442_s3, %s4442_s3 }
  0x31   :  { %p4449_p8 = por %p4448_p7, %p4447_p6 }
  0x33   :  { %p4450_p9 = pnand %p4449_p8, %p4443_p5 }
  0x35   :  { %4453 = shalt.err (!%p4450_p9)
}
  0x36   :  { %28 = dma.hbm_to_vmem [thread:$0]  %s5856_s0, 32, %s26_s28, [#allocation3]  }
  0x37   :  { %s4454_s18 = scalar_lea.hbm %s5858_s2, 128 }
  0x38   :  { %p4455_p10 = scmp.ne.s32.totalorder %s5858_s2, %s4454_s18  ;;  %p4458_p11 = scmp.lt.u32.totalorder %s4454_s18, %s5858_s2 }
  0x3a   :  { %p4460_p12 = pnand %p4458_p11, %p4455_p10 }
  0x3c   :  { %4463 = shalt.err (!%p4460_p12)
}
  0x3d   :  { %s4464_s24 = scalar_lea.vmem %s46_s30, 128  ;;  %p4469_p0 = scmp.lt.s32.totalorder %s46_s30, %s46_s30 }
  0x3e   :  { %p4465_p13 = scmp.ne.s32.totalorder %s46_s30, %s4464_s24  ;;  %p4470_p1 = scmp.lt.s32.totalorder %s4464_s24, %s4464_s24 }
  0x40   :  { %p4471_p2 = por %p4470_p1, %p4469_p0 }
  0x42   :  { %p4472_p3 = pnand %p4471_p2, %p4465_p13 }
  0x44   :  { %4475 = shalt.err (!%p4472_p3)
}
  0x45   :  { %48 = dma.hbm_to_vmem [thread:$0]  %s5858_s2, 128, %s46_s30, [#allocation6]  }
  0x46   :  { %s4582_s26 = smov [#allocation10]   ;;  %s4583_s29 = smov [#allocation11]  }
  0x47   :  { %s66_s28 = sshll.u32 %s4582_s26, 4  ;;  %s78_s8 = sshll.u32 %s4583_s29, 4  ;;  %s67_s28 = int_to_ptr.vmem [resolvable:$true] %s66_s28  ;;  %s4687_s8 = int_to_ptr.vmem [resolvable:$true] %s78_s8 }
  0x48   :  { %s4476_s11 = scalar_lea.hbm %s5860_s4, 3072 }
  0x49   :  { %p4477_p4 = scmp.ne.s32.totalorder %s5860_s4, %s4476_s11  ;;  %p4480_p5 = scmp.lt.u32.totalorder %s4476_s11, %s5860_s4 }
  0x4b   :  { %p4482_p6 = pnand %p4480_p5, %p4477_p4 }
  0x4d   :  { %4485 = shalt.err (!%p4482_p6)
}
  0x4e   :  { %s4486_s2 = scalar_lea.vmem %s67_s28, 3072  ;;  %p4491_p8 = scmp.lt.s32.totalorder %s67_s28, %s67_s28 }
  0x4f   :  { %p4487_p7 = scmp.ne.s32.totalorder %s67_s28, %s4486_s2  ;;  %p4492_p9 = scmp.lt.s32.totalorder %s4486_s2, %s4486_s2 }
  0x51   :  { %p4493_p10 = por %p4492_p9, %p4491_p8 }
  0x53   :  { %p4494_p11 = pnand %p4493_p10, %p4487_p7 }
  0x55   :  { %4497 = shalt.err (!%p4494_p11)
}
  0x56   :  { %72 = dma.hbm_to_vmem [thread:$0]  %s5860_s4, 3072, %s67_s28, [#allocation9], %s4578_s1, %s4578_s1, %s4579_s23  }
  0x57   :  { %s4498_s17 = scalar_lea.hbm %s5861_s5, 256 }
  0x58   :  { %p4499_p12 = scmp.ne.s32.totalorder %s5861_s5, %s4498_s17  ;;  %p4502_p13 = scmp.lt.u32.totalorder %s4498_s17, %s5861_s5 }
  0x5a   :  { %p4504_p0 = pnand %p4502_p13, %p4499_p12 }
  0x5c   :  { %4507 = shalt.err (!%p4504_p0)
}
  0x5d   :  { %s4508_s22 = scalar_lea.vmem %s4687_s8, 256  ;;  %p4513_p2 = scmp.lt.s32.totalorder %s4687_s8, %s4687_s8 }
  0x5e   :  { %p4509_p1 = scmp.ne.s32.totalorder %s4687_s8, %s4508_s22  ;;  %p4514_p3 = scmp.lt.s32.totalorder %s4508_s22, %s4508_s22 }
  0x60   :  { %p4515_p4 = por %p4514_p3, %p4513_p2 }
  0x62   :  { %p4516_p5 = pnand %p4515_p4, %p4509_p1 }
  0x64   :  { %4519 = shalt.err (!%p4516_p5)
}
  0x65   :  { %84 = dma.hbm_to_vmem [thread:$0]  %s5861_s5, 256, %s4687_s8, [#allocation12], %s4578_s1, %s4578_s1, %s4579_s23  }
  0x66   :  { %4564 = dma.done.wait [#allocation3], 32  }
  0x67   :  { %4565 = vsyncadd [#allocation3], 4294967264 }
  0x68   :  { %4566 = dma.done.wait [#allocation6], 160  }
  0x69   :  { %4567 = vsyncadd [#allocation6], 4294967136 }
  0x6a   :  { %4568 = dma.done.wait [#allocation9], 3840  }
  0x6b   :  { %4569 = vsyncadd [#allocation9], 4294963456 }
  0x6c   :  { %4570 = dma.done.wait [#allocation12], 256  }
  0x6d   :  { %4571 = vsyncadd [#allocation12], 4294967040  ;;  %v5873_v0 = vmov 0.0   ;;  %v4726_v1 = vld [vmem:[#allocation10] sm:$0xff]  ;;  %v4728_v2 = vld [vmem:[#allocation10 + $0x8] sm:$0xff]  ;;  %vm157_vm0 = vcmask 130048  }
  0x6e   :  { %225 = vmatprep.mubr.f32.mxu0 %v5873_v0  ;;  %962 = vmatprep.mubr.f32.mxu1 %v5873_v0  ;;  %v108_v3 = vld [vmem:[#allocation8] sm:$0xff]  ;;  %v123_v4 = vunpack.c.h.bf16 %v4726_v1  ;;  %v125_v5 = vunpack.c.h.bf16 %v4728_v2  ;;  %v109_v6 = vld [vmem:[#allocation8 + $0x8] sm:$0xff]  ;;  %v122_v8 = vunpack.c.l.bf16 %v4726_v1  ;;  %v124_v13 = vunpack.c.l.bf16 %v4728_v2  ;;  %v103_v15 = vld [vmem:[#allocation2] sm:$0x3]  ;;  %s4587_s5 = smov [#allocation13]   ;;  %s4588_s25 = smov [#allocation14]  }
  0x6f   :  { %v110_v7 = vunpack.c.l.bf16 %v108_v3  ;;  %v4733_v9 = vld [vmem:[#allocation10 + $0x10] sm:$0xff]  ;;  %v4735_v10 = vld [vmem:[#allocation10 + $0x18] sm:$0xff]  ;;  %v112_v11 = vunpack.c.l.bf16 %v109_v6  ;;  %v4737_v12 = vcombine.high %v108_v3, %v109_v6  ;;  %v4740_v14 = vcombine.low %v108_v3, %v109_v6  ;;  %v4771_v32 = vld [vmem:[#allocation10 + $0x20] sm:$0xff]  ;;  %s3762_s0 = sshll.u32 %s4587_s5, 4  ;;  %s3774_s26 = sshll.u32 %s4588_s25, 4  ;;  %s3763_s0 = int_to_ptr.vmem [resolvable:$true] %s3762_s0  ;;  %s5819_s26 = int_to_ptr.vmem [resolvable:$true] %s3774_s26 }
  0x70   :  { %v4742_v16 = vsub.f32 %v123_v4, %v123_v4  ;;  %v4744_v17 = vsub.f32 %v125_v5, %v125_v5  ;;  %v4748_v19 = vsub.f32 %v122_v8, %v122_v8  ;;  %v4753_v21 = vsub.f32 %v124_v13, %v124_v13  ;;  %v4777_v37 = vld [vmem:[#allocation10 + $0x28] sm:$0xff]  ;;  %v4808_v54 = vld [vmem:[#allocation10 + $0x30] sm:$0xff]  ;;  %v4814_v59 = vld [vmem:[#allocation10 + $0x38] sm:$0xff]  ;;  %s4520_s28 = scalar_lea.vmem %s3763_s0, 256  ;;  %p4525_p7 = scmp.lt.s32.totalorder %s3763_s0, %s3763_s0 }
  0x71   :  { %v4746_v18 = vsub.f32 %v110_v7, %v110_v7  ;;  %3812 = vmatprep.subr.bf16.mxu0 %v4737_v12  ;;  %v4751_v20 = vsub.f32 %v112_v11, %v112_v11  ;;  %v127_v22 = vunpack.c.h.bf16 %v4733_v9  ;;  %v129_v23 = vunpack.c.h.bf16 %v4735_v10  ;;  %p4521_p6 = scmp.ne.s32.totalorder %s3763_s0, %s4520_s28  ;;  %p4526_p8 = scmp.lt.s32.totalorder %s4520_s28, %s4520_s28 }
  0x72   :  { %v3869_v24 = vpack.c.bf16 %v4744_v17, %v4742_v16  ;;  %3814 = vmatpush1.bf16.msra.mxu0 %v4740_v14  ;;  %v159_v25 = vsel %vm157_vm0, %v103_v15, 0  ;;  %v126_v26 = vunpack.c.l.bf16 %v4733_v9  ;;  %v128_v27 = vunpack.c.l.bf16 %v4735_v10 }
  0x73   :  { %v3871_v28 = vpack.c.bf16 %v4753_v21, %v4748_v19  ;;  %v4765_v29 = vsub.f32 %v127_v22, %v127_v22  ;;  %v4767_v30 = vsub.f32 %v129_v23, %v129_v23  ;;  %v4769_v31 = vand.u32 4294901760, %v159_v25  ;;  %p4527_p9 = por %p4526_p8, %p4525_p7 }
  0x74   :  { %vm657_vm1 = vcmask 1046528   ;;  %3870 = vmatprep.subr.bf16.mxu1 %v3869_v24  ;;  %v4773_v33 = vsub.f32 %v126_v26, %v126_v26  ;;  %v4775_v34 = vsub.f32 %v128_v27, %v128_v27  ;;  %v111_v35 = vunpack.c.h.bf16 %v108_v3  ;;  %v104_v24 = vld [vmem:[#allocation5] sm:$0x3] }
  0x75   :  { %v113_v36 = vunpack.c.h.bf16 %v109_v6  ;;  %3872 = vmatpush1.bf16.msra.mxu1 %v3871_v28  ;;  %v3873_v38 = vpack.c.bf16 %v4767_v30, %v4765_v29  ;;  %v4782_v39 = vsub.f32 %v159_v25, %v4769_v31  ;;  %v243_v40 = vand.u32 4294901760, %v4746_v18  ;;  %p4528_p10 = pnand %p4527_p9, %p4521_p6 }
  0x76   :  { %v253_v41 = vand.u32 4294901760, %v4751_v20  ;;  %v3875_v42 = vpack.c.bf16 %v4775_v34, %v4773_v33  ;;  %v4788_v43 = vsub.f32 %v111_v35, %v111_v35  ;;  %v131_v45 = vunpack.c.h.bf16 %v4771_v32 }
  0x77   :  { %v4790_v44 = vsub.f32 %v113_v36, %v113_v36  ;;  %3874 = vmatprep.subr.bf16.mxu1 %v3873_v38  ;;  %v4794_v46 = vand.u32 4294901760, %v4782_v39  ;;  %v244_v47 = vsub.f32 %v4746_v18, %v243_v40  ;;  %v133_v49 = vunpack.c.h.bf16 %v4777_v37 }
  0x78   :  { %v254_v48 = vsub.f32 %v4751_v20, %v253_v41  ;;  %v238_v50 = vand.u32 4294901760, %v4788_v43  ;;  %v4805_v52 = vsub.f32 %v131_v45, %v131_v45  ;;  %v130_v53 = vunpack.c.l.bf16 %v4771_v32 }
  0x79   :  { %v248_v51 = vand.u32 4294901760, %v4790_v44  ;;  %v229_v55 = vsub.f32 %v4782_v39, %v4794_v46  ;;  %3876 = vmatpush1.bf16.msra.mxu1 %v3875_v42  ;;  %v245_v56 = vand.u32 4294901760, %v244_v47  ;;  %v4812_v58 = vsub.f32 %v133_v49, %v133_v49 }
  0x7a   :  { %v255_v57 = vand.u32 4294901760, %v254_v48  ;;  %v239_v60 = vsub.f32 %v4788_v43, %v238_v50  ;;  %v132_v62 = vunpack.c.l.bf16 %v4777_v37  ;;  %v4823_v63 = vsub.f32 %v130_v53, %v130_v53 }
  0x7b   :  { %v249_v61 = vsub.f32 %v4790_v44, %v248_v51  ;;  %v4825_v3 = vand.u32 4294901760, %v229_v55  ;;  %v3877_v4 = vpack.c.bf16 %v4812_v58, %v4805_v52  ;;  %v135_v5 = vunpack.c.h.bf16 %v4808_v54 }
  0x7c   :  { %vm653_vm2 = vcmask 515072   ;;  %v240_v6 = vand.u32 4294901760, %v239_v60  ;;  %v4830_v8 = vsub.f32 %v132_v62, %v132_v62  ;;  %v137_v11 = vunpack.c.h.bf16 %v4814_v59 }
  0x7d   :  { %5906 = vst [vmem:[#allocation22_spill] sm:$0xff] %v4825_v3  ;;  %v250_v7 = vand.u32 4294901760, %v249_v61  ;;  %231 = vmatmul.mubr.f32.vlgmr.msra.gmra.mrb[0].mxu0 %v4825_v3  ;;  %v3817_v13 = vpack.c.bf16 %v255_v57, %v245_v56  ;;  %3878 = vmatprep.subr.bf16.mxu1 %v3877_v4  ;;  %v4834_v15 = vsub.f32 %v135_v5, %v135_v5  ;;  %v134_v22 = vunpack.c.l.bf16 %v4808_v54 }
  0x7e   :  { %v136_v23 = vunpack.c.l.bf16 %v4814_v59  ;;  %v3879_v26 = vpack.c.bf16 %v4830_v8, %v4823_v63  ;;  %317 = vmatprep.mubr.f32.mxu0 %v5873_v0  ;;  %v662_v27 = vsel %vm657_vm1, %v137_v11, 0  ;;  %v3819_v28 = vpack.c.bf16 %v4790_v44, %v4788_v43 }
  0x7f   :  { %v3815_v25 = vpack.c.bf16 %v250_v7, %v240_v6  ;;  %v4844_v35 = vsub.f32 %v662_v27, %v662_v27  ;;  %v4847_v38 = vsub.f32 %v134_v22, %v134_v22  ;;  %v655_v45 = vsel %vm653_vm2, %v104_v24, 0 }
  0x80   :  { %v659_v36 = vsel %vm657_vm1, %v136_v23, 0  ;;  %3880 = vmatpush1.bf16.msra.mxu1 %v3879_v26  ;;  %v4856_v48 = vcombine.high %v4726_v1, %v4728_v2  ;;  %v4858_v49 = vand.u32 4294901760, %v655_v45  ;;  %v3821_v55 = vpack.c.bf16 %v4751_v20, %v4746_v18  ;;  %v4972_v26 = vld [vmem:[#allocation8 + $0x28] sm:$0xff] }
  0x81   :  { %3816 = vmatprep.subr.bf16.mxu0 %v3815_v25  ;;  %v4849_v42 = vsub.f32 %v659_v36, %v659_v36  ;;  %v3881_v47 = vpack.c.bf16 %v4844_v35, %v4834_v15  ;;  %v4869_v57 = vcombine.low %v4726_v1, %v4728_v2  ;;  %v4875_v60 = vcombine.high %v4733_v9, %v4735_v10  ;;  %v4970_v25 = vld [vmem:[#allocation8 + $0x20] sm:$0xff] }
  0x82   :  { %3818 = vmatpush1.bf16.msra.mxu0 %v3817_v13  ;;  %v4865_v56 = vsub.f32 %v655_v45, %v4858_v49  ;;  %v4883_v1 = vcombine.low %v4733_v9, %v4735_v10  ;;  %v4889_v2 = vcombine.high %v4771_v32, %v4777_v37  ;;  %v3827_v61 = vpack.c.bf16 %v248_v51, %v238_v50 }
  0x83   :  { %v3883_v53 = vpack.c.bf16 %v4849_v42, %v4847_v38  ;;  %3820 = vmatprep.subr.bf16.mxu0 %v3819_v28  ;;  %3882 = vmatprep.subr.bf16.mxu1 %v3881_v47  ;;  %v4898_v62 = vcombine.low %v4771_v32, %v4777_v37  ;;  %v4904_v9 = vcombine.high %v4808_v54, %v4814_v59  ;;  %v743_v10 = vand.u32 4294901760, %v4742_v16 }
  0x84   :  { %v753_v43 = vand.u32 4294901760, %v4744_v17  ;;  %vm4585_vm3 = vmmov 1   ;;  %v4918_v32 = vcombine.low %v4808_v54, %v4814_v59  ;;  %v748_v37 = vand.u32 4294901760, %v4748_v19 }
  0x85   :  { %3884 = vmatpush1.bf16.msra.mxu1 %v3883_v53  ;;  %319 = vmatmul.mubr.f32.vlgmr.msra.gmra.mrb[0].mxu0 %v4769_v31  ;;  %vm4909_vm4 = vmpackc.low %vm657_vm1, %vm4585_vm3  ;;  %v758_v50 = vand.u32 4294901760, %v4753_v21  ;;  %v763_v4 = vand.u32 4294901760, %v4765_v29  ;;  %v773_v5 = vand.u32 4294901760, %v4767_v30  ;;  %v3829_v54 = vpack.c.bf16 %v253_v41, %v243_v40 }
  0x86   :  { %3886 = vmatprep.subr.bf16.mxu1 %v4856_v48  ;;  %3822 = vmatpush1.bf16.msra.mxu0 %v3821_v55  ;;  %v3903_v51 = vpack.c.bf16 %v753_v43, %v743_v10  ;;  %v4936_v59 = vand.u32 4294901760, %v4865_v56  ;;  %v768_v7 = vand.u32 4294901760, %v4773_v33  ;;  %v778_v11 = vand.u32 4294901760, %v4775_v34 }
  0x87   :  { %393 = vmatprep.mubr.f32.mxu0 %v5873_v0  ;;  %3824 = vmatprep.subr.bf16.mxu0 %v4737_v12  ;;  %v3905_v6 = vpack.c.bf16 %v758_v50, %v748_v37  ;;  %v3907_v18 = vpack.c.bf16 %v773_v5, %v763_v4  ;;  %v783_v20 = vand.u32 4294901760, %v4805_v52  ;;  %v793_v40 = vand.u32 4294901760, %v4812_v58 }
  0x88   :  { %965 = vmatmul.mubr.f32.vlgmr.msra.gmra.mrb[0].mxu1 %v4865_v56  ;;  %5909 = vst [vmem:[#allocation23_spill] sm:$0xff] %v4936_v59  ;;  %v3909_v41 = vpack.c.bf16 %v778_v11, %v768_v7  ;;  %v788_v13 = vand.u32 4294901760, %v4823_v63  ;;  %v798_v22 = vand.u32 4294901760, %v4830_v8  ;;  %v814_v24 = vand.u32 4294901760, %v4844_v35 }
  0x89   :  { %3888 = vmatpush1.bf16.msra.mxu1 %v4869_v57  ;;  %1037 = vmatprep.mubr.f32.mxu1 %v5873_v0  ;;  %v3911_v23 = vpack.c.bf16 %v793_v40, %v783_v20  ;;  %v808_v28 = vand.u32 4294901760, %v4847_v38  ;;  %v820_v36 = vand.u32 4294901760, %v4849_v42  ;;  %v2343_v47 = vunpack.c.h.bf16 %v4970_v25 }
  0x8a   :  { %3890 = vmatprep.subr.bf16.mxu1 %v4875_v60  ;;  %v3913_v27 = vpack.c.bf16 %v798_v22, %v788_v13  ;;  %v2345_v53 = vunpack.c.h.bf16 %v4972_v26  ;;  %vm646_vm5 = vcmask 1041409   ;;  %vm3584_vm6 = vcmask 1040384  }
  0x8b   :  { %v3917_v55 = vpack.c.bf16 %v820_v36, %v808_v28  ;;  %vm3589_vm7 = vcmask 1041408  }
  0x8d   :  { %3892 = vmatpush1.bf16.msra.mxu1 %v4883_v1  ;;  %396 = vmatmul.mubr.f32.vlgmr.msra.gmra.mrb[0].mxu0 %v4782_v39 }
  0x8e   :  { %3894 = vmatprep.subr.bf16.mxu1 %v4889_v2  ;;  %3826 = vmatpush1.bf16.msra.mxu0 %v4740_v14 }
  0x8f   :  { %466 = vmatprep.mubr.f32.mxu0 %v5873_v0  ;;  %3828 = vmatprep.subr.bf16.mxu0 %v3827_v61  ;;  %v2342_v61 = vunpack.c.l.bf16 %v4970_v25 }
  0x91   :  { %3896 = vmatpush1.bf16.msra.mxu1 %v4898_v62 }
  0x92   :  { %3899 = vmatprep.subr.msk.bf16.mxu1 %vm4909_vm4, %v4904_v9 }
  0x95   :  { %3902 = vmatpush1.bf16.msk.msra.mxu1 %vm4909_vm4, %v4918_v32  ;;  %470 = vmatmul.mubr.f32.vlgmr.msra.gmra.mrb[0].mxu0 %v4794_v46 }
  0x96   :  { %3904 = vmatprep.subr.bf16.mxu1 %v3903_v51  ;;  %3830 = vmatpush1.bf16.msra.mxu0 %v3829_v54  ;;  %v2344_v51 = vunpack.c.l.bf16 %v4972_v26  ;;  %v4996_v54 = vsub.f32 %v2343_v47, %v2343_v47 }
  0x97   :  { %548 = vmatprep.mubr.f32.mxu0 %v5873_v0  ;;  %3832 = vmatprep.subr.bf16.mxu0 %v4737_v12  ;;  %v803_v12 = vand.u32 4294901760, %v4834_v15 }
  0x98   :  { %1041 = vmatmul.mubr.f32.vlgmr.msra.gmra.mrb[0].mxu1 %v4936_v59 }
  0x99   :  { %3906 = vmatpush1.bf16.msra.mxu1 %v3905_v6  ;;  %1145 = vmatprep.mubr.f32.mxu1 %v5873_v0  ;;  %v3915_v45 = vpack.c.bf16 %v814_v24, %v803_v12  ;;  %v4998_v6 = vsub.f32 %v2345_v53, %v2345_v53 }
  0x9a   :  { %3908 = vmatprep.subr.bf16.mxu1 %v3907_v18  ;;  %v5002_v18 = vsub.f32 %v2344_v51, %v2344_v51 }
  0x9c   :  { %v2481_v53 = vand.u32 4294901760, %v5002_v18 }
  0x9d   :  { %3910 = vmatpush1.bf16.msra.mxu1 %v3909_v41  ;;  %550 = vmatmul.mubr.f32.vlgmr.msra.gmra.mrb[0].mxu0 %v4769_v31  ;;  %v2466_v41 = vand.u32 4294901760, %v4996_v54 }
  0x9e   :  { %3912 = vmatprep.subr.bf16.mxu1 %v3911_v23  ;;  %3834 = vmatpush1.bf16.msra.mxu0 %v4740_v14  ;;  %v5000_v14 = vsub.f32 %v2342_v61, %v2342_v61  ;;  %v2476_v23 = vand.u32 4294901760, %v4998_v6 }
  0x9f   :  { %620 = vmatprep.mubr.f32.mxu0 %v5873_v0  ;;  %3836 = vmatprep.subr.bf16.mxu0 %v4856_v48 }
  0xa0   :  { %v2471_v47 = vand.u32 4294901760, %v5000_v14 }
  0xa1   :  { %3914 = vmatpush1.bf16.msra.mxu1 %v3913_v27  ;;  %v744_v27 = vsub.f32 %v4742_v16, %v743_v10  ;;  %v2467_v16 = vsub.f32 %v4996_v54, %v2466_v41  ;;  %v759_v10 = vsub.f32 %v4753_v21, %v758_v50  ;;  %v779_v21 = vsub.f32 %v4775_v34, %v778_v11  ;;  %v5060_v50 = vld [vmem:[#allocation8 + $0x10] sm:$0xff] }
  0xa2   :  { %3916 = vmatprep.subr.bf16.mxu1 %v3915_v45  ;;  %v734_v45 = vsub.f32 %v4865_v56, %v4936_v59  ;;  %v784_v34 = vsub.f32 %v4805_v52, %v783_v20 }
  0xa3   :  { %v760_v11 = vand.u32 4294901760, %v759_v10  ;;  %v780_v20 = vand.u32 4294901760, %v779_v21 }
  0xa5   :  { %3918 = vmatpush1.bf16.msra.mxu1 %v3917_v55  ;;  %622 = vmatmul.mubr.f32.vlgmr.msra.gmra.mrb[0].mxu0 %v4769_v31  ;;  %v745_v55 = vand.u32 4294901760, %v744_v27 }
  0xa6   :  { %3920 = vmatprep.subr.bf16.mxu1 %v4856_v48  ;;  %3838 = vmatpush1.bf16.msra.mxu0 %v4869_v57  ;;  %v754_v48 = vsub.f32 %v4744_v17, %v753_v43  ;;  %v2477_v17 = vsub.f32 %v4998_v6, %v2476_v23  ;;  %v774_v43 = vsub.f32 %v4767_v30, %v773_v5 }
  0xa7   :  { %730 = vmatprep.mubr.f32.mxu0 %v5873_v0  ;;  %3840 = vmatprep.subr.bf16.mxu0 %v4875_v60  ;;  %v2482_v30 = vsub.f32 %v5002_v18, %v2481_v53  ;;  %v794_v5 = vsub.f32 %v4812_v58, %v793_v40 }
  0xa8   :  { %1147 = vmatmul.mubr.f32.vlgmr.msra.gmra.mrb[0].mxu1 %v4858_v49  ;;  %v755_v61 = vand.u32 4294901760, %v754_v48  ;;  %v775_v27 = vand.u32 4294901760, %v774_v43 }
  0xa9   :  { %3922 = vmatpush1.bf16.msra.mxu1 %v4869_v57  ;;  %1219 = vmatprep.mubr.f32.mxu1 %v5873_v0  ;;  %v749_v57 = vsub.f32 %v4748_v19, %v748_v37  ;;  %v769_v19 = vsub.f32 %v4773_v33, %v768_v7  ;;  %v5049_v37 = vand.u32 4294901760, %v734_v45  ;;  %v2468_v33 = vand.u32 4294901760, %v2467_v16 }
  0xaa   :  { %3924 = vmatprep.subr.bf16.mxu1 %v4875_v60  ;;  %3842 = vmatpush1.bf16.msra.mxu0 %v4883_v1  ;;  %v764_v60 = vsub.f32 %v4765_v29, %v763_v4  ;;  %v2472_v29 = vsub.f32 %v5000_v14, %v2471_v47  ;;  %v5062_v4 = vld [vmem:[#allocation8 + $0x18] sm:$0xff]  ;;  %v1233_v45 = vunpack.c.h.bf16 %v5060_v50  ;;  %v2483_v40 = vand.u32 4294901760, %v2482_v30 }
  0xab   :  { %3844 = vmatprep.subr.bf16.mxu0 %v4889_v2  ;;  %v750_v7 = vand.u32 4294901760, %v749_v57  ;;  %v770_v48 = vand.u32 4294901760, %v769_v19  ;;  %v1235_v52 = vunpack.c.h.bf16 %v5062_v4  ;;  %v789_v16 = vsub.f32 %v4823_v63, %v788_v13 }
  0xac   :  { %v765_v51 = vand.u32 4294901760, %v764_v60  ;;  %v2473_v58 = vand.u32 4294901760, %v2472_v29  ;;  %v785_v57 = vand.u32 4294901760, %v784_v34  ;;  %v795_v10 = vand.u32 4294901760, %v794_v5 }
  0xad   :  { %3926 = vmatpush1.bf16.msra.mxu1 %v4883_v1  ;;  %v2478_v1 = vand.u32 4294901760, %v2477_v17  ;;  %v799_v60 = vsub.f32 %v4830_v8, %v798_v22  ;;  %v1234_v63 = vunpack.c.l.bf16 %v5062_v4  ;;  %v815_v13 = vsub.f32 %v4844_v35, %v814_v24 }
  0xae   :  { %3928 = vmatprep.subr.bf16.mxu1 %v4889_v2  ;;  %3846 = vmatpush1.bf16.msra.mxu0 %v4898_v62  ;;  %v3853_v2 = vpack.c.bf16 %v755_v61, %v745_v55  ;;  %v3857_v43 = vpack.c.bf16 %v775_v27, %v765_v51  ;;  %v1232_v55 = vunpack.c.l.bf16 %v5060_v50  ;;  %v5098_v8 = vsub.f32 %v1233_v45, %v1233_v45 }
  0xaf   :  { %3849 = vmatprep.subr.msk.bf16.mxu0 %vm4909_vm4, %v4904_v9  ;;  %v4067_v17 = vpack.c.bf16 %v2478_v1, %v2468_v33  ;;  %v5100_v22 = vsub.f32 %v1235_v52, %v1235_v52  ;;  %v3859_v61 = vpack.c.bf16 %v780_v20, %v770_v48  ;;  %v4069_v19 = vpack.c.bf16 %v2483_v40, %v2473_v58 }
  0xb0   :  { %v790_v21 = vand.u32 4294901760, %v789_v16  ;;  %v3861_v29 = vpack.c.bf16 %v795_v10, %v785_v57  ;;  %v809_v35 = vsub.f32 %v4847_v38, %v808_v28  ;;  %v5115_v24 = vsub.f32 %v1232_v55, %v1232_v55 }
  0xb1   :  { %3930 = vmatpush1.bf16.msra.mxu1 %v4898_v62  ;;  %v3855_v62 = vpack.c.bf16 %v760_v11, %v750_v7  ;;  %v5117_v30 = vsub.f32 %v1234_v63, %v1234_v63  ;;  %v816_v1 = vand.u32 4294901760, %v815_v13  ;;  %v1356_v34 = vand.u32 4294901760, %v5098_v8 }
  0xb2   :  { %3933 = vmatprep.subr.msk.bf16.mxu1 %vm4909_vm4, %v4904_v9  ;;  %3852 = vmatpush1.bf16.msk.msra.mxu0 %vm4909_vm4, %v4918_v32  ;;  %v804_v9 = vsub.f32 %v4834_v15, %v803_v12  ;;  %v800_v15 = vand.u32 4294901760, %v799_v60  ;;  %v4071_v12 = vpack.c.bf16 %v4998_v6, %v4996_v54  ;;  %v1366_v38 = vand.u32 4294901760, %v5100_v22  ;;  %v2347_v6 = vld [vmem:[#allocation10 + $0x80] sm:$0xff] }
  0xb3   :  { %3854 = vmatprep.subr.bf16.mxu0 %v3853_v2  ;;  %v810_v5 = vand.u32 4294901760, %v809_v35  ;;  %v1361_v11 = vand.u32 4294901760, %v5115_v24  ;;  %v1371_v51 = vand.u32 4294901760, %v5117_v30  ;;  %v1357_v2 = vsub.f32 %v5098_v8, %v1356_v34  ;;  %v2352_v35 = vld [vmem:[#allocation10 + $0xa8] sm:$0xff] }
  0xb4   :  { %v805_v33 = vand.u32 4294901760, %v804_v9  ;;  %v3863_v28 = vpack.c.bf16 %v800_v15, %v790_v21  ;;  %v1367_v48 = vsub.f32 %v5100_v22, %v1366_v38  ;;  %v5148_v58 = vcombine.high %v5060_v50, %v5062_v4 }
  0xb5   :  { %3936 = vmatpush1.bf16.msk.msra.mxu1 %vm4909_vm4, %v4918_v32  ;;  %736 = vmatmul.mubr.f32.vlgmr.msra.gmra.mrb[2].mxu0 %v5049_v37  ;;  %v821_v32 = vsub.f32 %v4849_v42, %v820_v36  ;;  %v4073_v42 = vpack.c.bf16 %v5002_v18, %v5000_v14  ;;  %v5127_v36 = vcombine.high %v4970_v25, %v4972_v26  ;;  %v1358_v40 = vand.u32 4294901760, %v1357_v2 }
  0xb6   :  { %4068 = vmatprep.subr.bf16.mxu1 %v4067_v17  ;;  %3856 = vmatpush1.bf16.msra.mxu0 %v3855_v62  ;;  %v3865_v27 = vpack.c.bf16 %v816_v1, %v805_v33  ;;  %v1362_v52 = vsub.f32 %v5115_v24, %v1361_v11  ;;  %v1372_v20 = vsub.f32 %v5117_v30, %v1371_v51  ;;  %v1368_v16 = vand.u32 4294901760, %v1367_v48 }
  0xb7   :  { %872 = vmatprep.mubr.f32.mxu0 %v5873_v0  ;;  %3858 = vmatprep.subr.bf16.mxu0 %v3857_v43  ;;  %5910 = vst [vmem:[#allocation24_spill] sm:$0xff] %v5127_v36  ;;  %v822_v7 = vand.u32 4294901760, %v821_v32  ;;  %v5152_v17 = vcombine.low %v4970_v25, %v4972_v26  ;;  %v4079_v57 = vpack.c.bf16 %v2476_v23, %v2466_v41  ;;  %v2348_v41 = vld [vmem:[#allocation10 + $0x88] sm:$0xff]  ;;  %v2355_v23 = vunpack.c.l.bf16 %v2347_v6 }
  0xb8   :  { %1221 = vmatmul.mubr.f32.vlgmr.msra.gmra.mrb[0].mxu1 %v4858_v49  ;;  %v5160_v10 = vcombine.low %v5060_v50, %v5062_v4  ;;  %v1363_v60 = vand.u32 4294901760, %v1362_v52  ;;  %v1373_v62 = vand.u32 4294901760, %v1372_v20  ;;  %v3941_v43 = vpack.c.bf16 %v1368_v16, %v1358_v40  ;;  %v2350_v4 = vld [vmem:[#allocation10 + $0x98] sm:$0xff] }
  0xb9   :  { %4070 = vmatpush1.bf16.msra.mxu1 %v4069_v19  ;;  %2545 = vmatprep.mubr.f32.mxu1 %v5873_v0  ;;  %v3867_v45 = vpack.c.bf16 %v822_v7, %v810_v5  ;;  %5911 = vst [vmem:[#allocation25_spill] sm:$0xff] %v5152_v17  ;;  %v3945_v26 = vpack.c.bf16 %v5100_v22, %v5098_v8  ;;  %v2357_v50 = vunpack.c.l.bf16 %v2348_v41  ;;  %v2356_v63 = vunpack.c.h.bf16 %v2347_v6  ;;  %v5221_v8 = vld [vmem:[#allocation10 + $0xb8] sm:$0xff] }
  0xba   :  { %4072 = vmatprep.subr.bf16.mxu1 %v4071_v12  ;;  %3860 = vmatpush1.bf16.msra.mxu0 %v3859_v61  ;;  %v3943_v25 = vpack.c.bf16 %v1373_v62, %v1363_v60  ;;  %v4081_v54 = vpack.c.bf16 %v2481_v53, %v2471_v47  ;;  %v3947_v14 = vpack.c.bf16 %v5117_v30, %v5115_v24  ;;  %v2349_v53 = vld [vmem:[#allocation10 + $0x90] sm:$0xff]  ;;  %v2361_v13 = vunpack.c.l.bf16 %v2350_v4  ;;  %v2351_v12 = vld [vmem:[#allocation10 + $0xa0] sm:$0xff]  ;;  %v5249_v62 = vld [vmem:[#allocation10 + $0x48] sm:$0xff] }
  0xbb   :  { %3862 = vmatprep.subr.bf16.mxu0 %v3861_v29  ;;  %v5182_v18 = vsub.f32 %v2355_v23, %v2355_v23  ;;  %v5184_v47 = vsub.f32 %v2357_v50, %v2357_v50  ;;  %v2359_v55 = vunpack.c.l.bf16 %v2349_v53  ;;  %v5187_v9 = vcombine.high %v2347_v6, %v2348_v41  ;;  %v5247_v60 = vld [vmem:[#allocation10 + $0x40] sm:$0xff] }
  0xbc   :  { %2547 = vmatmul.mubr.f32.vlgmr.msra.gmra.mrb[2].mxu1 %v4769_v31  ;;  %v2358_v61 = vunpack.c.h.bf16 %v2348_v41  ;;  %v5190_v19 = vcombine.low %v2347_v6, %v2348_v41  ;;  %v5192_v21 = vcombine.high %v2349_v53, %v2350_v4  ;;  %v2360_v29 = vunpack.c.h.bf16 %v2349_v53 }
  0xbd   :  { %4074 = vmatpush1.bf16.msra.mxu1 %v4073_v42  ;;  %2621 = vmatprep.mubr.f32.mxu1 %v5873_v0  ;;  %v5196_v15 = vcombine.low %v2349_v53, %v2350_v4  ;;  %v5867_v32 = vand.u32 4294901760, %v5182_v18  ;;  %v5866_v33 = vand.u32 4294901760, %v5184_v47  ;;  %v2362_v1 = vunpack.c.h.bf16 %v2350_v4 }
  0xbe   :  { %4076 = vmatprep.subr.bf16.mxu1 %v5127_v36  ;;  %3864 = vmatpush1.bf16.msra.mxu0 %v3863_v28  ;;  %v5202_v42 = vsub.f32 %v2359_v55, %v2359_v55  ;;  %v3953_v28 = vpack.c.bf16 %v1366_v38, %v1356_v34  ;;  %v2363_v5 = vunpack.c.l.bf16 %v2351_v12  ;;  %v5208_v7 = vsub.f32 %v2356_v63, %v2356_v63 }
  0xbf   :  { %3866 = vmatprep.subr.bf16.mxu0 %v3865_v27  ;;  %v5211_v27 = vsub.f32 %v2361_v13, %v2361_v13  ;;  %v5217_v2 = vpack.c.bf16 %v1371_v51, %v1361_v11  ;;  %v2365_v48 = vunpack.c.l.bf16 %v2352_v35  ;;  %v5223_v22 = vsub.f32 %v2358_v61, %v2358_v61 }
  0xc0   :  { %v5225_v34 = vcombine.high %v2351_v12, %v2352_v35  ;;  %v5227_v38 = vcombine.low %v2351_v12, %v2352_v35  ;;  %v2369_v52 = vunpack.c.l.bf16 %v5221_v8  ;;  %v5230_v20 = vsub.f32 %v2360_v29, %v2360_v29 }
  0xc1   :  { %v2969_v24 = vsub.f32 %v5182_v18, %v5867_v32  ;;  %v2979_v30 = vsub.f32 %v5184_v47, %v5866_v33  ;;  %v5238_v11 = vsub.f32 %v2362_v1, %v2362_v1  ;;  %v2364_v51 = vunpack.c.h.bf16 %v2351_v12 }
  0xc2   :  { %3868 = vmatpush1.bf16.msra.mxu0 %v3867_v45  ;;  %v5219_v45 = vld [vmem:[#allocation10 + $0xb0] sm:$0xff]  ;;  %5912 = vst [vmem:[#allocation26_spill] sm:$0xff] %v5225_v34  ;;  %5913 = vst [vmem:[#allocation27_spill] sm:$0xff] %v5227_v38  ;;  %v5240_v40 = vsub.f32 %v2363_v5, %v2363_v5  ;;  %v1247_v6 = vunpack.c.l.bf16 %v5249_v62  ;;  %v5864_v23 = vand.u32 4294901760, %v5230_v20  ;;  %v2370_v50 = vunpack.c.h.bf16 %v5221_v8 }
  0xc3   :  { %3938 = vmatprep.subr.bf16.mxu0 %v5148_v58  ;;  %v5244_v16 = vcombine.high %v5219_v45, %v5221_v8  ;;  %v5261_v41 = vcombine.low %v5219_v45, %v5221_v8  ;;  %v2980_v53 = vand.u32 4294901760, %v2979_v30  ;;  %v5868_v4 = vand.u32 4294901760, %v5238_v11 }
  0xc4   :  { %2624 = vmatmul.mubr.f32.vlgmr.msra.gmra.mrb[2].mxu1 %v4782_v39  ;;  %v5268_v55 = vsub.f32 %v2364_v51, %v2364_v51  ;;  %v5277_v13 = vcombine.high %v5247_v60, %v5249_v62  ;;  %v2368_v29 = vunpack.c.h.bf16 %v5219_v45  ;;  %v5288_v1 = vsub.f32 %v1247_v6, %v1247_v6 }
  0xc5   :  { %4078 = vmatpush1.bf16.msra.mxu1 %v5152_v17  ;;  %2694 = vmatprep.mubr.f32.mxu1 %v5873_v0  ;;  %5914 = vst [vmem:[#allocation28_spill] sm:$0xff] %v5244_v16  ;;  %5915 = vst [vmem:[#allocation29_spill] sm:$0xff] %v5261_v41  ;;  %v2984_v5 = vsub.f32 %v5230_v20, %v5864_v23  ;;  %v2882_v30 = vsel %vm657_vm1, %v2370_v50, 0  ;;  %v2367_v50 = vunpack.c.l.bf16 %v5219_v45 }
  0xc6   :  { %874 = vmatmul.mubr.f32.vlgmr.msra.gmra.mrb[2].mxu0 %v4858_v49  ;;  %4080 = vmatprep.subr.bf16.mxu1 %v4079_v57  ;;  %v5872_v57 = vand.u32 4294901760, %v5208_v7  ;;  %5916 = vst [vmem:[#allocation30_spill] sm:$0xff] %v5277_v13  ;;  %v5871_v23 = vand.u32 4294901760, %v5268_v55  ;;  %v5317_v32 = vsub.f32 %v2368_v29, %v2368_v29 }
  0xc7   :  { %3940 = vmatpush1.bf16.msra.mxu0 %v5160_v10  ;;  %1343 = vmatprep.mubr.f32.mxu0 %v5873_v0 }
  0xc8   :  { %3942 = vmatprep.subr.bf16.mxu0 %v3941_v43  ;;  %v2366_v43 = vunpack.c.h.bf16 %v2352_v35  ;;  %v2964_v63 = vsub.f32 %v5208_v7, %v5872_v57 }
  0xca   :  { %1349 = vmatmul.mubr.f32.vlgmr.msra.gmra.mrb[4].mxu0 %v4825_v3  ;;  %v5279_v61 = vsub.f32 %v2366_v43, %v2366_v43  ;;  %v2994_v43 = vsub.f32 %v5238_v11, %v5868_v4  ;;  %v5325_v4 = vsub.f32 %v2882_v30, %v2882_v30  ;;  %v1248_v30 = vunpack.c.h.bf16 %v5249_v62 }
  0xcb   :  { %3944 = vmatpush1.bf16.msra.mxu0 %v3943_v25  ;;  %1435 = vmatprep.mubr.f32.mxu0 %v5873_v0  ;;  %v5252_v25 = vsub.f32 %v2365_v48, %v2365_v48  ;;  %v5296_v48 = vcombine.low %v5247_v60, %v5249_v62  ;;  %v5373_v62 = vld [vmem:[#allocation10 + $0x68] sm:$0xff] }
  0xcc   :  { %2698 = vmatmul.mubr.f32.vlgmr.msra.gmra.mrb[2].mxu1 %v4794_v46  ;;  %3946 = vmatprep.subr.bf16.mxu0 %v3945_v26  ;;  %v5869_v26 = vand.u32 4294901760, %v5223_v22  ;;  %v5875_v33 = vand.u32 4294901760, %v5279_v61 }
  0xcd   :  { %4082 = vmatpush1.bf16.msra.mxu1 %v4081_v54  ;;  %2776 = vmatprep.mubr.f32.mxu1 %v5873_v0  ;;  %v1245_v54 = vunpack.c.l.bf16 %v5247_v60  ;;  %5917 = vst [vmem:[#allocation31_spill] sm:$0xff] %v5296_v48 }
  0xce   :  { %4084 = vmatprep.subr.bf16.mxu1 %v5127_v36  ;;  %v2974_v12 = vsub.f32 %v5223_v22, %v5869_v26  ;;  %v2879_v26 = vsel %vm657_vm1, %v2369_v52, 0  ;;  %v3004_v52 = vsub.f32 %v5268_v55, %v5871_v23  ;;  %v5354_v23 = vld [vmem:[#allocation10 + $0x60] sm:$0xff] }
  0xcf   :  { %v5286_v35 = vsub.f32 %v1245_v54, %v1245_v54  ;;  %v5311_v54 = vld [vmem:[#allocation10 + $0x58] sm:$0xff] }
  0xd0   :  { %v3005_v3 = vand.u32 4294901760, %v3004_v52  ;;  %v1252_v36 = vunpack.c.h.bf16 %v5311_v54 }
  0xd2   :  { %1437 = vmatmul.mubr.f32.vlgmr.msra.gmra.mrb[4].mxu0 %v4769_v31 }
  0xd3   :  { %3948 = vmatpush1.bf16.msra.mxu0 %v3947_v14  ;;  %1511 = vmatprep.mubr.f32.mxu0 %v5873_v0  ;;  %v2970_v14 = vand.u32 4294901760, %v2969_v24  ;;  %v5303_v24 = vld [vmem:[#allocation10 + $0x50] sm:$0xff] }
  0xd4   :  { %2778 = vmatmul.mubr.f32.vlgmr.msra.gmra.mrb[2].mxu1 %v4769_v31  ;;  %3950 = vmatprep.subr.bf16.mxu0 %v5148_v58  ;;  %v1249_v6 = vunpack.c.l.bf16 %v5303_v24  ;;  %v5334_v29 = vcombine.high %v5303_v24, %v5311_v54 }
  0xd5   :  { %4086 = vmatpush1.bf16.msra.mxu1 %v5152_v17  ;;  %2848 = vmatprep.mubr.f32.mxu1 %v5873_v0  ;;  %v5306_v51 = vpack.c.bf16 %v2980_v53, %v2970_v14  ;;  %v2975_v14 = vand.u32 4294901760, %v2974_v12  ;;  %v2995_v12 = vand.u32 4294901760, %v2994_v43  ;;  %v5919_v17 = vand.u32 4294901760, %v5240_v40 }
  0xd6   :  { %4088 = vmatprep.subr.bf16.mxu1 %v5187_v9  ;;  %5918 = vst [vmem:[#allocation32_spill] sm:$0xff] %v5334_v29 }
  0xda   :  { %1514 = vmatmul.mubr.f32.vlgmr.msra.gmra.mrb[4].mxu0 %v4782_v39  ;;  %v5865_v39 = vand.u32 4294901760, %v5202_v42 }
  0xdb   :  { %3952 = vmatpush1.bf16.msra.mxu0 %v5160_v10  ;;  %1584 = vmatprep.mubr.f32.mxu0 %v5873_v0 }
  0xdc   :  { %2850 = vmatmul.mubr.f32.vlgmr.msra.gmra.mrb[2].mxu1 %v4769_v31  ;;  %3954 = vmatprep.subr.bf16.mxu0 %v3953_v28  ;;  %v5870_v28 = vand.u32 4294901760, %v5211_v27  ;;  %v5301_v8 = vsub.f32 %v5202_v42, %v5865_v39  ;;  %v2965_v39 = vand.u32 4294901760, %v2964_v63  ;;  %v2985_v63 = vand.u32 4294901760, %v2984_v5 }
  0xdd   :  { %4090 = vmatpush1.bf16.msra.mxu1 %v5190_v19  ;;  %2950 = vmatprep.mubr.f32.mxu1 %v5873_v0  ;;  %v3014_v5 = vsub.f32 %v5279_v61, %v5875_v33 }
  0xde   :  { %4092 = vmatprep.subr.bf16.mxu1 %v5192_v21  ;;  %v2999_v53 = vsub.f32 %v5211_v27, %v5870_v28  ;;  %v2990_v45 = vand.u32 4294901760, %v5301_v8  ;;  %v5347_v28 = vsub.f32 %v2367_v50, %v2367_v50  ;;  %v4105_v43 = vpack.c.bf16 %v2975_v14, %v2965_v39 }
  0xdf   :  { %v4109_v8 = vpack.c.bf16 %v2995_v12, %v2985_v63  ;;  %v3009_v39 = vsub.f32 %v5240_v40, %v5919_v17  ;;  %v5920_v14 = vand.u32 4294901760, %v5252_v25  ;;  %v5922_v17 = vand.u32 4294901760, %v5325_v4 }
  0xe0   :  { %v3000_v33 = vand.u32 4294901760, %v2999_v53 }
  0xe1   :  { %4094 = vmatpush1.bf16.msra.mxu1 %v5196_v15  ;;  %v3019_v57 = vsub.f32 %v5252_v25, %v5920_v14  ;;  %v3035_v12 = vsub.f32 %v5325_v4, %v5922_v17  ;;  %v1250_v14 = vunpack.c.h.bf16 %v5303_v24 }
  0xe2   :  { %1588 = vmatmul.mubr.f32.vlgmr.msra.gmra.mrb[4].mxu0 %v4794_v46  ;;  %4096 = vmatprep.subr.bf16.mxu1 %v5225_v34  ;;  %v1251_v46 = vunpack.c.l.bf16 %v5311_v54  ;;  %v4111_v63 = vpack.c.bf16 %v3000_v33, %v2990_v45  ;;  %v5926_v45 = vand.u32 4294901760, %v5347_v28 }
  0xe3   :  { %3956 = vmatpush1.bf16.msra.mxu0 %v5217_v2  ;;  %1666 = vmatprep.mubr.f32.mxu0 %v5873_v0  ;;  %v1246_v0 = vunpack.c.h.bf16 %v5247_v60  ;;  %v5359_v2 = vsub.f32 %v1249_v6, %v1249_v6  ;;  %v3015_v60 = vand.u32 4294901760, %v3014_v5  ;;  %v5921_v6 = vand.u32 4294901760, %v5317_v32 }
  0xe4   :  { %3958 = vmatprep.subr.bf16.mxu0 %v5148_v58  ;;  %v5349_v58 = vsub.f32 %v2879_v26, %v2879_v26  ;;  %v5361_v50 = vsub.f32 %v1251_v46, %v1251_v46  ;;  %v1253_v26 = vunpack.c.l.bf16 %v5354_v23  ;;  %v5386_v5 = vsub.f32 %v1248_v30, %v1248_v30 }
  0xe5   :  { %4098 = vmatpush1.bf16.msra.mxu1 %v5227_v38  ;;  %v3024_v53 = vsub.f32 %v5317_v32, %v5921_v6  ;;  %v5384_v52 = vsub.f32 %v1246_v0, %v1246_v0  ;;  %v5923_v6 = vmov 0.0   ;;  %v5393_v46 = vcombine.low %v5303_v24, %v5311_v54 }
  0xe6   :  { %4101 = vmatprep.subr.msk.bf16.mxu1 %vm4909_vm4, %v5244_v16  ;;  %v3010_v0 = vand.u32 4294901760, %v3009_v39  ;;  %v3020_v30 = vand.u32 4294901760, %v3019_v57  ;;  %v5403_v17 = vsub.f32 %v1253_v26, %v1253_v26  ;;  %v4113_v33 = vpack.c.bf16 %v3015_v60, %v3005_v3  ;;  %v1244_v60 = vld [vmem:[#allocation10 + $0x78] sm:$0xff] }
  0xe7   :  { %5924 = vst [vmem:[#allocation33_spill] sm:$0xff] %v5393_v46  ;;  %v3025_v24 = vand.u32 4294901760, %v3024_v53  ;;  %v3029_v54 = vsub.f32 %v5347_v28, %v5926_v45  ;;  %v5927_v59 = vand.u32 4294901760, %v5349_v58  ;;  %v3036_v57 = vand.u32 4294901760, %v3035_v12 }
  0xe8   :  { %v5423_v53 = vsub.f32 %v1252_v36, %v1252_v36  ;;  %v4115_v45 = vpack.c.bf16 %v3020_v30, %v3010_v0  ;;  %v1259_v12 = vunpack.c.l.bf16 %v1244_v60  ;;  %v5895_v39 = vand.u32 4294901760, %v5286_v35 }
  0xe9   :  { %4104 = vmatpush1.bf16.msk.msra.mxu1 %vm4909_vm4, %v5261_v41  ;;  %v5415_v41 = vsub.f32 %v1250_v14, %v1250_v14  ;;  %v1256_v26 = vunpack.c.h.bf16 %v5373_v62  ;;  %v3030_v14 = vand.u32 4294901760, %v3029_v54  ;;  %v5896_v16 = vand.u32 4294901760, %v5288_v1 }
  0xea   :  { %1668 = vmatmul.mubr.f32.vlgmr.msra.gmra.mrb[4].mxu0 %v4769_v31  ;;  %4106 = vmatprep.subr.bf16.mxu1 %v4105_v43  ;;  %v1255_v43 = vunpack.c.l.bf16 %v5373_v62  ;;  %v1260_v38 = vunpack.c.h.bf16 %v1244_v60  ;;  %v4117_v36 = vpack.c.bf16 %v3036_v57, %v3025_v24  ;;  %v5928_v34 = vand.u32 4294901760, %v5384_v52 }
  0xeb   :  { %3960 = vmatpush1.bf16.msra.mxu0 %v5160_v10  ;;  %1738 = vmatprep.mubr.f32.mxu0 %v5923_v6  ;;  %v5401_v10 = vcombine.high %v5354_v23, %v5373_v62  ;;  %v5929_v0 = vand.u32 4294901760, %v5386_v5  ;;  %v1859_v24 = vsub.f32 %v5286_v35, %v5895_v39  ;;  %v5452_v54 = vsub.f32 %v1256_v26, %v1256_v26 }
  0xec   :  { %2956 = vmatmul.mubr.f32.vlgmr.msra.gmra.mrb[4].mxu1 %v5049_v37  ;;  %3962 = vmatprep.subr.bf16.mxu0 %v5277_v13  ;;  %v3041_v13 = vsub.f32 %v5349_v58, %v5927_v59  ;;  %v5417_v3 = vsub.f32 %v1255_v43, %v1255_v43  ;;  %v1254_v59 = vunpack.c.h.bf16 %v5354_v23  ;;  %v4125_v26 = vpack.c.bf16 %v5238_v11, %v5230_v20 }
  0xed   :  { %5925 = vst [vmem:[#allocation34_spill] sm:$0xff] %v5401_v10  ;;  %4108 = vmatpush1.bf16.msra.mxu1 %v5306_v51  ;;  %3092 = vmatprep.mubr.f32.mxu1 %v5923_v6  ;;  %v5421_v51 = vcombine.low %v5354_v23, %v5373_v62  ;;  %v1854_v23 = vsub.f32 %v5384_v52, %v5928_v34 }
  0xee   :  { %4110 = vmatprep.subr.bf16.mxu1 %v4109_v8  ;;  %v1243_v8 = vld [vmem:[#allocation10 + $0x70] sm:$0xff]  ;;  %v3042_v43 = vand.u32 4294901760, %v3041_v13  ;;  %v1864_v30 = vsub.f32 %v5386_v5, %v5929_v0  ;;  %v1869_v62 = vsub.f32 %v5288_v1, %v5896_v16  ;;  %v1769_v16 = vsel %vm657_vm1, %v1259_v12, 0 }
  0xef   :  { %v5438_v13 = vcombine.high %v1243_v8, %v1244_v60  ;;  %v5447_v34 = vcombine.low %v1243_v8, %v1244_v60  ;;  %v1258_v57 = vunpack.c.h.bf16 %v1243_v8  ;;  %v1855_v60 = vand.u32 4294901760, %v1854_v23 }
  0xf0   :  { %v4119_v0 = vpack.c.bf16 %v3042_v43, %v3030_v14  ;;  %v5933_v14 = vand.u32 4294901760, %v5423_v53  ;;  %v5903_v23 = vand.u32 4294901760, %v5403_v17 }
  0xf1   :  { %4112 = vmatpush1.bf16.msra.mxu1 %v4111_v63  ;;  %5930 = vst [vmem:[#allocation35_spill] sm:$0xff] %v5438_v13  ;;  %v4121_v63 = vpack.c.bf16 %v5223_v22, %v5208_v7  ;;  %5931 = vst [vmem:[#allocation36_spill] sm:$0xff] %v5447_v34 }
  0xf2   :  { %1740 = vmatmul.mubr.f32.vlgmr.msra.gmra.mrb[4].mxu0 %v4769_v31  ;;  %4114 = vmatprep.subr.bf16.mxu1 %v4113_v33  ;;  %v5444_v33 = vsub.f32 %v1254_v59, %v1254_v59  ;;  %v1772_v31 = vsel %vm657_vm1, %v1260_v38, 0  ;;  %v1884_v43 = vsub.f32 %v5423_v53, %v5933_v14  ;;  %v1860_v59 = vand.u32 4294901760, %v1859_v24 }
  0xf3   :  { %3964 = vmatpush1.bf16.msra.mxu0 %v5296_v48  ;;  %1840 = vmatprep.mubr.f32.mxu0 %v5923_v6  ;;  %v5932_v48 = vand.u32 4294901760, %v5415_v41  ;;  %v5934_v14 = vand.u32 4294901760, %v5359_v2 }
  0xf4   :  { %3966 = vmatprep.subr.bf16.mxu0 %v5334_v29  ;;  %v1865_v29 = vand.u32 4294901760, %v1864_v30  ;;  %v5472_v30 = vsub.f32 %v1258_v57, %v1258_v57  ;;  %v5935_v57 = vand.u32 4294901760, %v5361_v50  ;;  %v1885_v12 = vand.u32 4294901760, %v1884_v43 }
  0xf5   :  { %4116 = vmatpush1.bf16.msra.mxu1 %v4115_v45  ;;  %v1874_v39 = vsub.f32 %v5415_v41, %v5932_v48  ;;  %v4123_v45 = vpack.c.bf16 %v5184_v47, %v5182_v18  ;;  %v5474_v48 = vsub.f32 %v1772_v31, %v1772_v31 }
  0xf6   :  { %4118 = vmatprep.subr.bf16.mxu1 %v4117_v36  ;;  %v1257_v36 = vunpack.c.l.bf16 %v1243_v8  ;;  %v1879_v8 = vsub.f32 %v5359_v2, %v5934_v14  ;;  %v3979_v38 = vpack.c.bf16 %v1865_v29, %v1855_v60  ;;  %v1889_v31 = vsub.f32 %v5361_v50, %v5935_v57 }
  0xf7   :  { %3968 = vmatpush1.bf16.msra.mxu0 %v5393_v46  ;;  %v1870_v46 = vand.u32 4294901760, %v1869_v62  ;;  %v5490_v62 = vsub.f32 %v1769_v16, %v1769_v16  ;;  %v5936_v29 = vand.u32 4294901760, %v5444_v33  ;;  %v4127_v16 = vpack.c.bf16 %v5211_v27, %v5202_v42 }
  0xf8   :  { %3970 = vmatprep.subr.bf16.mxu0 %v5401_v10  ;;  %v1875_v10 = vand.u32 4294901760, %v1874_v39  ;;  %v5488_v24 = vsub.f32 %v1257_v36, %v1257_v36  ;;  %v4129_v14 = vpack.c.bf16 %v5279_v61, %v5268_v55  ;;  %v5938_v36 = vand.u32 4294901760, %v5417_v3 }
  0xf9   :  { %4120 = vmatpush1.bf16.msra.mxu1 %v4119_v0  ;;  %v1894_v39 = vsub.f32 %v5444_v33, %v5936_v29  ;;  %v3981_v57 = vpack.c.bf16 %v1870_v46, %v1860_v59  ;;  %v1880_v29 = vand.u32 4294901760, %v1879_v8  ;;  %v1890_v0 = vand.u32 4294901760, %v1889_v31 }
  0xfa   :  { %4122 = vmatprep.subr.bf16.mxu1 %v4121_v63  ;;  %v5937_v63 = vand.u32 4294901760, %v5452_v54  ;;  %v1909_v43 = vsub.f32 %v5417_v3, %v5938_v36  ;;  %v5939_v8 = vand.u32 4294901760, %v5472_v30 }
  0xfb   :  { %3972 = vmatpush1.bf16.msra.mxu0 %v5421_v51  ;;  %v1895_v46 = vand.u32 4294901760, %v1894_v39 }
  0xfc   :  { %3975 = vmatprep.subr.msk.bf16.mxu0 %vm4909_vm4, %v5438_v13  ;;  %3094 = vmatmul.mubr.f32.vlgmr.msra.gmra.mrb[4].mxu1 %v4858_v49  ;;  %v1904_v60 = vsub.f32 %v5452_v54, %v5937_v63  ;;  %v1899_v63 = vsub.f32 %v5403_v17, %v5903_v23  ;;  %v1918_v13 = vand.u32 4294901760, %v5488_v24  ;;  %v1914_v31 = vsub.f32 %v5472_v30, %v5939_v8 }
  0xfd   :  { %4124 = vmatpush1.bf16.msra.mxu1 %v4123_v45  ;;  %3182 = vmatprep.mubr.f32.mxu1 %v5923_v6  ;;  %v3983_v45 = vpack.c.bf16 %v1885_v12, %v1875_v10  ;;  %v5940_v23 = vand.u32 4294901760, %v5474_v48  ;;  %v4131_v10 = vpack.c.bf16 %v5252_v25, %v5240_v40  ;;  %v3985_v12 = vpack.c.bf16 %v1890_v0, %v1880_v29 }
  0xfe   :  { %4126 = vmatprep.subr.bf16.mxu1 %v4125_v26  ;;  %v1930_v26 = vand.u32 4294901760, %v5490_v62  ;;  %v1905_v59 = vand.u32 4294901760, %v1904_v60  ;;  %v1900_v39 = vand.u32 4294901760, %v1899_v63  ;;  %v1910_v60 = vand.u32 4294901760, %v1909_v43 }
  0xff   :  { %3978 = vmatpush1.bf16.msk.msra.mxu0 %vm4909_vm4, %v5447_v34  ;;  %v1925_v34 = vsub.f32 %v5474_v48, %v5940_v23  ;;  %v1919_v36 = vsub.f32 %v5488_v24, %v1918_v13 }
 0x100   :  { %3980 = vmatprep.subr.bf16.mxu0 %v3979_v38  ;;  %v4133_v38 = vpack.c.bf16 %v5325_v4, %v5317_v32  ;;  %v1931_v23 = vsub.f32 %v5490_v62, %v1930_v26  ;;  %v3989_v43 = vpack.c.bf16 %v1910_v60, %v1900_v39  ;;  %v5944_v39 = vand.u32 4294901760, %v5208_v7 }
 0x101   :  { %4128 = vmatpush1.bf16.msra.mxu1 %v4127_v16  ;;  %v1915_v16 = vand.u32 4294901760, %v1914_v31  ;;  %v1926_v0 = vand.u32 4294901760, %v1925_v34  ;;  %v3995_v34 = vpack.c.bf16 %v5386_v5, %v5384_v52  ;;  %v4001_v31 = vpack.c.bf16 %v5361_v50, %v5359_v2 }
 0x102   :  { %1846 = vmatmul.mubr.f32.vlgmr.msra.gmra.mrb[6].mxu0 %v5049_v37  ;;  %4130 = vmatprep.subr.bf16.mxu1 %v4129_v14  ;;  %v3987_v37 = vpack.c.bf16 %v1905_v59, %v1895_v46  ;;  %v4135_v14 = vpack.c.bf16 %v5349_v58, %v5347_v28  ;;  %v1932_v29 = vand.u32 4294901760, %v1931_v23  ;;  %v3999_v46 = vpack.c.bf16 %v5423_v53, %v5415_v41  ;;  %v5941_v59 = vld [vmem:[#allocation26_spill] sm:$0xff] }
 0x103   :  { %3982 = vmatpush1.bf16.msra.mxu0 %v3981_v57  ;;  %1982 = vmatprep.mubr.f32.mxu0 %v5923_v6  ;;  %v1920_v57 = vand.u32 4294901760, %v1919_v36  ;;  %v3991_v63 = vpack.c.bf16 %v1926_v0, %v1915_v16  ;;  %v5945_v60 = vand.u32 4294901760, %v5223_v22  ;;  %v4005_v23 = vpack.c.bf16 %v5417_v3, %v5403_v17  ;;  %v5946_v16 = vld [vmem:[#allocation29_spill] sm:$0xff] }
 0x104   :  { %3984 = vmatprep.subr.bf16.mxu0 %v3983_v45  ;;  %v3997_v45 = vpack.c.bf16 %v5288_v1, %v5286_v35  ;;  %v5947_v0 = vand.u32 4294901760, %v5182_v18  ;;  %v5949_v22 = vand.u32 4294901760, %v5230_v20  ;;  %v5953_v18 = vand.u32 4294901760, %v5211_v27 }
 0x105   :  { %4132 = vmatpush1.bf16.msra.mxu1 %v4131_v10  ;;  %v3993_v8 = vpack.c.bf16 %v1932_v29, %v1920_v57  ;;  %v4003_v10 = vpack.c.bf16 %v5452_v54, %v5444_v33  ;;  %v4155_v36 = vpack.c.bf16 %v5945_v60, %v5944_v39  ;;  %v4009_v29 = vpack.c.bf16 %v5490_v62, %v5488_v24  ;;  %v5961_v39 = vld [vmem:[#allocation31_spill] sm:$0xff]  ;;  %v5693_v24 = vld [vmem:[#allocation7] sm:$0x77] }
 0x106   :  { %4134 = vmatprep.subr.bf16.mxu1 %v4133_v38  ;;  %v5943_v38 = vld [vmem:[#allocation28_spill] sm:$0xff]  ;;  %v5954_v20 = vand.u32 4294901760, %v5268_v55  ;;  %v5959_v27 = vand.u32 4294901760, %v5317_v32  ;;  %v5967_v32 = vld [vmem:[#allocation35_spill] sm:$0xff] }
 0x107   :  { %3986 = vmatpush1.bf16.msra.mxu0 %v3985_v12  ;;  %v5942_v12 = vld [vmem:[#allocation27_spill] sm:$0xff] }
 0x108   :  { %3988 = vmatprep.subr.bf16.mxu0 %v3987_v37  ;;  %v4007_v37 = vpack.c.bf16 %v5474_v48, %v5472_v30 }
 0x109   :  { %4136 = vmatpush1.bf16.msra.mxu1 %v4135_v14  ;;  %v5948_v14 = vand.u32 4294901760, %v5184_v47 }
 0x10a   :  { %4138 = vmatprep.subr.bf16.mxu1 %v5187_v9 }
 0x10b   :  { %3990 = vmatpush1.bf16.msra.mxu0 %v3989_v43  ;;  %v4157_v7 = vpack.c.bf16 %v5948_v14, %v5947_v0  ;;  %v5950_v43 = vand.u32 4294901760, %v5238_v11  ;;  %v5955_v11 = vand.u32 4294901760, %v5279_v61  ;;  %v5962_v61 = vld [vmem:[#allocation32_spill] sm:$0xff] }
 0x10c   :  { %3992 = vmatprep.subr.bf16.mxu0 %v3991_v63  ;;  %3185 = vmatmul.mubr.f32.vlgmr.msra.gmra.mrb[4].mxu1 %v4865_v56  ;;  %v5951_v63 = vld [vmem:[#allocation23_spill] sm:$0xff] }
 0x10d   :  { %4140 = vmatpush1.bf16.msra.mxu1 %v5190_v19  ;;  %3257 = vmatprep.mubr.f32.mxu1 %v5923_v6  ;;  %v4159_v57 = vpack.c.bf16 %v5950_v43, %v5949_v22 }
 0x10e   :  { %4142 = vmatprep.subr.bf16.mxu1 %v5192_v21 }
 0x10f   :  { %3994 = vmatpush1.bf16.msra.mxu0 %v3993_v8  ;;  %v5952_v8 = vand.u32 4294901760, %v5202_v42 }
 0x110   :  { %3996 = vmatprep.subr.bf16.mxu0 %v3995_v34  ;;  %v4163_v34 = vpack.c.bf16 %v5955_v11, %v5954_v20 }
 0x111   :  { %4144 = vmatpush1.bf16.msra.mxu1 %v5196_v15  ;;  %v4161_v47 = vpack.c.bf16 %v5953_v18, %v5952_v8  ;;  %v5703_v8 = vld [vmem:[#allocation11 + $0x8] sm:$0x77] }
 0x112   :  { %1984 = vmatmul.mubr.f32.vlgmr.msra.gmra.mrb[6].mxu0 %v4858_v49  ;;  %4146 = vmatprep.subr.bf16.mxu1 %v5941_v59 }
 0x113   :  { %3998 = vmatpush1.bf16.msra.mxu0 %v3997_v45  ;;  %2072 = vmatprep.mubr.f32.mxu0 %v5923_v6  ;;  %v5956_v45 = vld [vmem:[#allocation30_spill] sm:$0xff] }
 0x114   :  { %4000 = vmatprep.subr.bf16.mxu0 %v3999_v46  ;;  %v5957_v46 = vand.u32 4294901760, %v5240_v40  ;;  %v5963_v40 = vand.u32 4294901760, %v5347_v28  ;;  %v5969_v28 = vand.u32 4294901760, %v5386_v5  ;;  %v5974_v5 = vand.u32 4294901760, %v5423_v53 }
 0x115   :  { %4148 = vmatpush1.bf16.msra.mxu1 %v5942_v12 }
 0x116   :  { %4151 = vmatprep.subr.msk.bf16.mxu1 %vm4909_vm4, %v5943_v38 }
 0x117   :  { %4002 = vmatpush1.bf16.msra.mxu0 %v4001_v31  ;;  %v5958_v31 = vand.u32 4294901760, %v5252_v25  ;;  %v5964_v25 = vand.u32 4294901760, %v5349_v58 }
 0x118   :  { %4004 = vmatprep.subr.bf16.mxu0 %v4003_v10  ;;  %v5960_v10 = vand.u32 4294901760, %v5325_v4  ;;  %v5968_v4 = vand.u32 4294901760, %v5384_v52  ;;  %v5973_v52 = vand.u32 4294901760, %v5415_v41  ;;  %v5977_v41 = vand.u32 4294901760, %v5444_v33 }
 0x119   :  { %4154 = vmatpush1.bf16.msk.msra.mxu1 %vm4909_vm4, %v5946_v16  ;;  %v4165_v42 = vpack.c.bf16 %v5958_v31, %v5957_v46  ;;  %v4169_v60 = vpack.c.bf16 %v5964_v25, %v5963_v40  ;;  %v5982_v33 = vand.u32 4294901760, %v5474_v48 }
 0x11a   :  { %4156 = vmatprep.subr.bf16.mxu1 %v4155_v36  ;;  %v4167_v55 = vpack.c.bf16 %v5960_v10, %v5959_v27  ;;  %v5966_v36 = vld [vmem:[#allocation34_spill] sm:$0xff]  ;;  %v4029_v58 = vpack.c.bf16 %v5969_v28, %v5968_v4  ;;  %v4033_v14 = vpack.c.bf16 %v5974_v5, %v5973_v52 }
 0x11b   :  { %4006 = vmatpush1.bf16.msra.mxu0 %v4005_v23  ;;  %v5971_v23 = vand.u32 4294901760, %v5286_v35 }
 0x11c   :  { %4008 = vmatprep.subr.bf16.mxu0 %v4007_v37  ;;  %3261 = vmatmul.mubr.f32.vlgmr.msra.gmra.mrb[4].mxu1 %v5951_v63  ;;  %v5972_v37 = vand.u32 4294901760, %v5288_v1  ;;  %v5978_v1 = vand.u32 4294901760, %v5452_v54  ;;  %v4043_v54 = vpack.c.bf16 %v1930_v26, %v1918_v13  ;;  %v5985_v13 = vld [vmem:[#allocation22_spill] sm:$0xff] }
 0x11d   :  { %4158 = vmatpush1.bf16.msra.mxu1 %v4157_v7  ;;  %3365 = vmatprep.mubr.f32.mxu1 %v5923_v6 }
 0x11e   :  { %4160 = vmatprep.subr.bf16.mxu1 %v4159_v57  ;;  %v4031_v0 = vpack.c.bf16 %v5972_v37, %v5971_v23  ;;  %v4037_v53 = vpack.c.bf16 %v5978_v1, %v5977_v41 }
 0x11f   :  { %4010 = vmatpush1.bf16.msra.mxu0 %v4009_v29 }
 0x120   :  { %4012 = vmatprep.subr.bf16.mxu0 %v5956_v45 }
 0x121   :  { %4162 = vmatpush1.bf16.msra.mxu1 %v4161_v47 }
 0x122   :  { %2075 = vmatmul.mubr.f32.vlgmr.msra.gmra.mrb[6].mxu0 %v4865_v56  ;;  %4164 = vmatprep.subr.bf16.mxu1 %v4163_v34  ;;  %v5965_v56 = vld [vmem:[#allocation33_spill] sm:$0xff] }
 0x123   :  { %4014 = vmatpush1.bf16.msra.mxu0 %v5961_v39  ;;  %2147 = vmatprep.mubr.f32.mxu0 %v5923_v6 }
 0x124   :  { %4016 = vmatprep.subr.bf16.mxu0 %v5962_v61 }
 0x125   :  { %4166 = vmatpush1.bf16.msra.mxu1 %v4165_v42 }
 0x126   :  { %4168 = vmatprep.subr.bf16.mxu1 %v4167_v55 }
 0x127   :  { %4018 = vmatpush1.bf16.msra.mxu0 %v5965_v56 }
 0x128   :  { %4020 = vmatprep.subr.bf16.mxu0 %v5966_v36 }
 0x129   :  { %4170 = vmatpush1.bf16.msra.mxu1 %v4169_v60 }
 0x12a   :  { %4172 = vmatprep.subr.bf16.mxu1 %v5187_v9  ;;  %v5970_v9 = vld [vmem:[#allocation36_spill] sm:$0xff] }
 0x12b   :  { %4022 = vmatpush1.bf16.msra.mxu0 %v5421_v51 }
 0x12c   :  { %4025 = vmatprep.subr.msk.bf16.mxu0 %vm4909_vm4, %v5967_v32  ;;  %3367 = vmatmul.mubr.f32.vlgmr.msra.gmra.mrb[4].mxu1 %v4858_v49 }
 0x12d   :  { %4174 = vmatpush1.bf16.msra.mxu1 %v5190_v19  ;;  %3439 = vmatprep.mubr.f32.mxu1 %v5923_v6  ;;  %v5975_v19 = vand.u32 4294901760, %v5359_v2  ;;  %v5980_v2 = vand.u32 4294901760, %v5417_v3  ;;  %v5984_v3 = vld [vmem:[#allocation25_spill] sm:$0xff] }
 0x12e   :  { %4176 = vmatprep.subr.bf16.mxu1 %v5192_v21  ;;  %v5976_v21 = vand.u32 4294901760, %v5361_v50 }
 0x12f   :  { %4028 = vmatpush1.bf16.msk.msra.mxu0 %vm4909_vm4, %v5970_v9 }
 0x130   :  { %4030 = vmatprep.subr.bf16.mxu0 %v4029_v58  ;;  %v4035_v35 = vpack.c.bf16 %v5976_v21, %v5975_v19 }
 0x131   :  { %4178 = vmatpush1.bf16.msra.mxu1 %v5196_v15  ;;  %v5979_v15 = vand.u32 4294901760, %v5403_v17  ;;  %v5983_v17 = vld [vmem:[#allocation24_spill] sm:$0xff] }
 0x132   :  { %2151 = vmatmul.mubr.f32.vlgmr.msra.gmra.mrb[6].mxu0 %v5951_v63  ;;  %4180 = vmatprep.subr.bf16.mxu1 %v5941_v59  ;;  %v5981_v59 = vand.u32 4294901760, %v5472_v30  ;;  %v139_v30 = vlaneseq  ;;  %v5701_v63 = vld [vmem:[#allocation11] sm:$0x77] }
 0x133   :  { %4032 = vmatpush1.bf16.msra.mxu0 %v4031_v0  ;;  %2255 = vmatprep.mubr.f32.mxu0 %v5923_v6  ;;  %v4039_v50 = vpack.c.bf16 %v5980_v2, %v5979_v15 }
 0x134   :  { %4034 = vmatprep.subr.bf16.mxu0 %v4033_v14  ;;  %v4041_v7 = vpack.c.bf16 %v5982_v33, %v5981_v59 }
 0x135   :  { %4182 = vmatpush1.bf16.msra.mxu1 %v5942_v12 }
 0x136   :  { %4185 = vmatprep.subr.msk.bf16.mxu1 %vm4909_vm4, %v5943_v38 }
 0x137   :  { %4036 = vmatpush1.bf16.msra.mxu0 %v4035_v35 }
 0x138   :  { %4038 = vmatprep.subr.bf16.mxu0 %v4037_v53 }
 0x139   :  { %4188 = vmatpush1.bf16.msk.msra.mxu1 %vm4909_vm4, %v5946_v16 }
 0x13b   :  { %4040 = vmatpush1.bf16.msra.mxu0 %v4039_v50 }
 0x13c   :  { %4042 = vmatprep.subr.bf16.mxu0 %v4041_v7  ;;  %3441 = vmatmul.mubr.f32.vlgmr.msra.gmra.mrb[4].mxu1 %v4858_v49 }
 0x13f   :  { %4044 = vmatpush1.bf16.msra.mxu0 %v4043_v54 }
 0x140   :  { %4046 = vmatprep.subr.bf16.mxu0 %v5956_v45 }
 0x142   :  { %2257 = vmatmul.mubr.f32.vlgmr.msra.gmra.mrb[6].mxu0 %v4858_v49 }
 0x143   :  { %4048 = vmatpush1.bf16.msra.mxu0 %v5961_v39  ;;  %2329 = vmatprep.mubr.f32.mxu0 %v5923_v6 }
 0x144   :  { %4050 = vmatprep.subr.bf16.mxu0 %v5962_v61 }
 0x147   :  { %4052 = vmatpush1.bf16.msra.mxu0 %v5965_v56  ;;  %v4586_v56 = vmov 1966171168  }
 0x148   :  { %4054 = vmatprep.subr.bf16.mxu0 %v5966_v36  ;;  %v3453_v36 = vunpack.c.l.s4 %v4586_v56 }
 0x14a   :  { %v3454_v28 = vunpack.c.0.s8 %v3453_v36 }
 0x14b   :  { %4056 = vmatpush1.bf16.msra.mxu0 %v5421_v51  ;;  %v5688_v51 = vshrl.u32 %v139_v30, 7 }
 0x14c   :  { %4059 = vmatprep.subr.msk.bf16.mxu0 %vm4909_vm4, %v5967_v32 }
 0x14d   :  { %v5691_v48 = vsub.s32 0, %v5688_v51  ;;  %v145_v44 = vsub.s32 4, %v5688_v51  ;;  %v1267_v32 = vsub.s32 5, %v5688_v51  ;;  %v5719_v4 = vsub.s32 1, %v5688_v51 }
 0x14e   :  { %v5725_v23 = vsub.s32 %v3454_v28, %v5688_v51 }
 0x14f   :  { %4062 = vmatpush1.bf16.msk.msra.mxu0 %vm4909_vm4, %v5970_v9  ;;  %v142_v62 = vrot.slane %v5693_v24, %v5691_v48  ;;  %v633_v18 = vrot.slane %v5701_v63, %v5691_v48  ;;  %v641_v47 = vrot.slane %v5703_v8, %v5691_v48  ;;  %v637_v20 = vrot.slane %v5701_v63, %v145_v44 }
 0x150   :  { %4064 = vmatprep.subr.bf16.mxu0 %v5983_v17  ;;  %v645_v11 = vrot.slane %v5703_v8, %v145_v44  ;;  %v1264_v58 = vrot.slane %v5693_v24, %v5719_v4  ;;  %v1268_v9 = vrot.slane %v5693_v24, %v1267_v32 }
 0x151   :  { %v152_v26 = vrot.slane %v142_v62, %v5691_v48  ;;  %v647_v34 = vsel %vm646_vm5, %v641_v47, %v633_v18  ;;  %v2377_v18 = vsub.s32 6, %v5688_v51 }
 0x152   :  { %2331 = vmatmul.mubr.f32.vlgmr.msra.gmra.mrb[6].mxu0 %v4858_v49  ;;  %v146_v49 = vrot.slane %v5693_v24, %v145_v44  ;;  %v648_v45 = vsel %vm646_vm5, %v645_v11, %v637_v20  ;;  %v1274_v37 = vrot.slane %v1264_v58, %v5719_v4  ;;  %v1278_v0 = vrot.slane %v1268_v9, %v5719_v4 }
 0x153   :  { %4066 = vmatpush1.bf16.msra.mxu0 %v5984_v3  ;;  %2453 = vmatprep.mubr.f32.mxu0 %v5923_v6  ;;  %v2871_v28 = vrot.slane %v5703_v8, %v2377_v18 }
 0x154   :  { %v156_v6 = vrot.slane %v146_v49, %v5691_v48 }
 0x156   :  { %2459 = vmatmul.mubr.f32.vlgmr.msra.gmra.mrb[8].mxu0 %v5985_v13 }
 0x178   :  { %v623_v12 = vpop.f32.mrb[0].mxu0 }
 0x179   :  { %v4189_v38 = vadd.f32 %v623_v12, %v152_v26  ;;  %v625_v16 = vpop.f32.mrb[1].mxu0 }
 0x17a   :  { %v4190_v22 = vadd.f32 %v625_v16, %v156_v6  ;;  %v1749_v16 = vrot.slane %v5701_v63, %v5719_v4 }
 0x17b   :  { %v651_v31 = vadd.f32 %v4189_v38, %v647_v34  ;;  %v2378_v34 = vrot.slane %v5693_v24, %v2377_v18 }
 0x17c   :  { %v3451_v43 = vcombine.low %v4189_v38, %v4190_v22  ;;  %v652_v10 = vadd.f32 %v4190_v22, %v648_v45  ;;  %v1757_v22 = vrot.slane %v5703_v8, %v5719_v4 }
 0x17e   :  { %v3458_v52 = vrot.slane %v3451_v43, %v5725_v23  ;;  %v1753_v43 = vrot.slane %v5701_v63, %v1267_v32  ;;  %v1762_v47 = vsel %vm646_vm5, %v1757_v22, %v1749_v16 }
 0x180   :  { %v3459_v35 = vcombine.high %v3458_v52, %v3458_v52  ;;  %v3466_v1 = vrot.slane %v3458_v52, %v5725_v23 }
 0x182   :  { %v3473_v15 = vrot.slane %v3459_v35, %v5725_v23  ;;  %v3527_v59 = vrot.slane %v3466_v1, %v5691_v48  ;;  %v3531_v33 = vrot.slane %v3466_v1, %v5719_v4 }
 0x184   :  { %v3535_v3 = vrot.slane %v3473_v15, %v5691_v48  ;;  %v3539_v13 = vrot.slane %v3473_v15, %v5719_v4 }
 0x18b   :  { %v1222_v57 = vpop.f32.mrb[0].mxu1 }
 0x18c   :  { %v1224_v29 = vpop.f32.mrb[1].mxu1 }
 0x199   :  { %v875_v46 = vpop.f32.mrb[2].mxu0 }
 0x19a   :  { %v4191_v42 = vadd.f32 %v1222_v57, %v875_v46  ;;  %v877_v27 = vpop.f32.mrb[3].mxu0  ;;  %v1761_v57 = vrot.slane %v5703_v8, %v1267_v32  ;;  %v2863_v32 = vrot.slane %v5701_v63, %v2377_v18 }
 0x19b   :  { %v4192_v55 = vadd.f32 %v1224_v29, %v877_v27  ;;  %v2373_v29 = vsub.s32 2, %v5688_v51 }
 0x19c   :  { %v1227_v39 = vadd.f32 %v4191_v42, %v651_v31  ;;  %v1763_v20 = vsel %vm646_vm5, %v1761_v57, %v1753_v43 }
 0x19d   :  { %v1228_v61 = vadd.f32 %v4192_v55, %v652_v10  ;;  %v2374_v11 = vrot.slane %v5693_v24, %v2373_v29  ;;  %v2867_v51 = vrot.slane %v5703_v8, %v2373_v29  ;;  %v2388_v56 = vrot.slane %v2378_v34, %v2373_v29 }
 0x19f   :  { %v3606_v40 = vcombine.low %v1227_v39, %v1228_v61  ;;  %v2384_v55 = vrot.slane %v2374_v11, %v2373_v29  ;;  %v2859_v61 = vrot.slane %v5701_v63, %v2373_v29 }
 0x1a1   :  { %v3613_v45 = vrot.slane %v3606_v40, %v5725_v23  ;;  %v2872_v52 = vsel %vm646_vm5, %v2867_v51, %v2859_v61 }
 0x1a3   :  { %v3614_v36 = vcombine.high %v3613_v45, %v3613_v45  ;;  %v3621_v40 = vrot.slane %v3613_v45, %v5725_v23 }
 0x1a5   :  { %v3686_v1 = vrot.slane %v3621_v40, %v5719_v4 }
 0x1af   :  { %v5713_v25 = vpop.f32.mrb[2].mxu1 }
 0x1b0   :  { %v5715_v60 = vpop.f32.mrb[3].mxu1 }
 0x1c5   :  { %v1741_v5 = vpop.f32.mrb[4].mxu0 }
 0x1c6   :  { %v4193_v14 = vadd.f32 %v1741_v5, %v1274_v37  ;;  %v1743_v19 = vpop.f32.mrb[5].mxu0 }
 0x1c7   :  { %v4194_v21 = vadd.f32 %v1743_v19, %v1278_v0 }
 0x1c8   :  { %v1766_v46 = vadd.f32 %v4193_v14, %v1762_v47 }
 0x1c9   :  { %v3476_v41 = vcombine.low %v4193_v14, %v4194_v21  ;;  %v1767_v42 = vadd.f32 %v4194_v21, %v1763_v20  ;;  %v3628_v14 = vrot.slane %v3614_v36, %v5725_v23  ;;  %v2873_v21 = vsel %vm646_vm5, %v2871_v28, %v2863_v32 }
 0x1cb   :  { %v3483_v53 = vrot.slane %v3476_v41, %v5725_v23  ;;  %v3682_v41 = vrot.slane %v3621_v40, %v5691_v48 }
 0x1cd   :  { %v3484_v2 = vcombine.high %v3483_v53, %v3483_v53  ;;  %v3491_v50 = vrot.slane %v3483_v53, %v5725_v23 }
 0x1cf   :  { %v3498_v7 = vrot.slane %v3484_v2, %v5725_v23  ;;  %v3547_v54 = vrot.slane %v3491_v50, %v5691_v48  ;;  %v3551_v17 = vrot.slane %v3491_v50, %v5719_v4 }
 0x1d1   :  { %v3555_v30 = vrot.slane %v3498_v7, %v5691_v48  ;;  %v3559_v44 = vrot.slane %v3498_v7, %v5719_v4  ;;  %v5744_v62 = vsel %vm3584_vm6, %v3527_v59, %v3547_v54  ;;  %v5747_v49 = vsel %vm3584_vm6, %v3531_v33, %v3551_v17 }
 0x1d2   :  { %v3694_v33 = vrot.slane %v3628_v14, %v5719_v4 }
 0x1d3   :  { %v5750_v26 = vsel %vm3584_vm6, %v3535_v3, %v3555_v30  ;;  %v5753_v6 = vsel %vm3584_vm6, %v3539_v13, %v3559_v44 }
 0x20f   :  { %v3442_v12 = vpop.f32.mrb[4].mxu1 }
 0x210   :  { %v3444_v38 = vpop.f32.mrb[5].mxu1 }
 0x225   :  { %v2332_v31 = vpop.f32.mrb[6].mxu0 }
 0x226   :  { %v2337_v27 = vadd.f32 %v2332_v31, %v1766_v46  ;;  %v2334_v10 = vpop.f32.mrb[7].mxu0 }
 0x227   :  { %v2338_v39 = vadd.f32 %v2334_v10, %v1767_v42 }
 0x229   :  { %v3631_v24 = vcombine.low %v2337_v27, %v2338_v39  ;;  %v2460_v58 = vpop.f32.mrb[8].mxu0 }
 0x22a   :  { %v2461_v9 = vadd.f32 %v2460_v58, %v2384_v55  ;;  %v2462_v37 = vpop.f32.mrb[9].mxu0 }
 0x22b   :  { %v3638_v0 = vrot.slane %v3631_v24, %v5725_v23  ;;  %v2463_v5 = vadd.f32 %v2462_v37, %v2388_v56 }
 0x22c   :  { %v4196_v19 = vadd.f32 %v5713_v25, %v2461_v9  ;;  %v3690_v25 = vrot.slane %v3628_v14, %v5691_v48 }
 0x22d   :  { %v3639_v63 = vcombine.high %v3638_v0, %v3638_v0  ;;  %v3646_v8 = vrot.slane %v3638_v0, %v5725_v23  ;;  %v4198_v35 = vadd.f32 %v5715_v60, %v2463_v5 }
 0x22e   :  { %v2876_v53 = vadd.f32 %v4196_v19, %v2872_v52 }
 0x22f   :  { %v3653_v15 = vrot.slane %v3639_v63, %v5725_v23  ;;  %v3702_v2 = vrot.slane %v3646_v8, %v5691_v48  ;;  %v3706_v50 = vrot.slane %v3646_v8, %v5719_v4  ;;  %v2877_v59 = vadd.f32 %v4198_v35, %v2873_v21 }
 0x230   :  { %v3447_v7 = vadd.f32 %v3442_v12, %v2876_v53  ;;  %v3501_v54 = vcombine.low %v4196_v19, %v4198_v35 }
 0x231   :  { %v3710_v60 = vrot.slane %v3653_v15, %v5691_v48  ;;  %v3714_v17 = vrot.slane %v3653_v15, %v5719_v4  ;;  %v3448_v3 = vadd.f32 %v3444_v38, %v2877_v59  ;;  %v3739_v13 = vsel %vm3584_vm6, %v3682_v41, %v3702_v2 }
 0x232   :  { %v3508_v30 = vrot.slane %v3501_v54, %v5725_v23  ;;  %v3740_v44 = vsel %vm3584_vm6, %v3686_v1, %v3706_v50 }
 0x233   :  { %v3656_v16 = vcombine.low %v3447_v7, %v3448_v3  ;;  %v3741_v22 = vsel %vm3584_vm6, %v3690_v25, %v3710_v60  ;;  %v3742_v43 = vsel %vm3584_vm6, %v3694_v33, %v3714_v17 }
 0x234   :  { %v3509_v57 = vcombine.high %v3508_v30, %v3508_v30  ;;  %v3516_v12 = vrot.slane %v3508_v30, %v5725_v23 }
 0x235   :  { %v3663_v29 = vrot.slane %v3656_v16, %v5725_v23 }
 0x236   :  { %v3523_v18 = vrot.slane %v3509_v57, %v5725_v23  ;;  %v3567_v38 = vrot.slane %v3516_v12, %v5691_v48  ;;  %v3571_v47 = vrot.slane %v3516_v12, %v5719_v4 }
 0x237   :  { %v3664_v20 = vcombine.high %v3663_v29, %v3663_v29  ;;  %v3671_v11 = vrot.slane %v3663_v29, %v5725_v23 }
 0x238   :  { %v3575_v34 = vrot.slane %v3523_v18, %v5691_v48  ;;  %v3579_v45 = vrot.slane %v3523_v18, %v5719_v4  ;;  %v3590_v46 = vsel %vm3589_vm7, %v5744_v62, %v3567_v38  ;;  %v3591_v31 = vsel %vm3589_vm7, %v5747_v49, %v3571_v47 }
 0x239   :  { %v3598_v42 = vcombine.low %v3590_v46, %v3591_v31  ;;  %v3678_v27 = vrot.slane %v3664_v20, %v5725_v23  ;;  %v3722_v10 = vrot.slane %v3671_v11, %v5691_v48  ;;  %v3726_v55 = vrot.slane %v3671_v11, %v5719_v4 }
 0x23a   :  { %v3592_v39 = vsel %vm3589_vm7, %v5750_v26, %v3575_v34  ;;  %v3593_v61 = vsel %vm3589_vm7, %v5753_v6, %v3579_v45 }
 0x23b   :  { %v3599_v62 = vcombine.low %v3592_v39, %v3593_v61  ;;  %3602 = vst [vmem:[#allocation13] sm:$0x77] %v3598_v42  ;;  %v3730_v49 = vrot.slane %v3678_v27, %v5691_v48  ;;  %v3734_v51 = vrot.slane %v3678_v27, %v5719_v4  ;;  %v3743_v23 = vsel %vm3589_vm7, %v3739_v13, %v3722_v10 }
 0x23c   :  { %v3744_v56 = vsel %vm3589_vm7, %v3740_v44, %v3726_v55 }
 0x23d   :  { %3603 = vst [vmem:[#allocation13 + $0x8] sm:$0x77] %v3599_v62  ;;  %v3745_v36 = vsel %vm3589_vm7, %v3741_v22, %v3730_v49  ;;  %v3746_v26 = vsel %vm3589_vm7, %v3742_v43, %v3734_v51  ;;  %v3751_v32 = vcombine.low %v3743_v23, %v3744_v56 }
 0x23e   :  { %4531 = shalt.err (!%p4528_p10)
}
 0x23f   :  { %s4532_s9 = scalar_lea.hbm %s5862_s6, 256 }
 0x240   :  { %p4533_p11 = scmp.ne.s32.totalorder %s5862_s6, %s4532_s9  ;;  %p4536_p12 = scmp.lt.u32.totalorder %s4532_s9, %s5862_s6 }
 0x242   :  { %p4538_p13 = pnand %p4536_p12, %p4533_p11 }
 0x244   :  { %4541 = shalt.err (!%p4538_p13)
}
 0x245   :  { %3768 = dma.vmem_to_hbm [thread:$0]  %s3763_s0, 256, %s5862_s6, [#allocation4], %s4578_s1, %s4578_s1, %s4579_s23   ;;  %v3752_v48 = vcombine.low %v3745_v36, %v3746_v26  ;;  %3755 = vst [vmem:[#allocation14] sm:$0x77] %v3751_v32 }
 0x246   :  { %s4542_s2 = scalar_lea.vmem %s5819_s26, 256  ;;  %p4547_p1 = scmp.lt.s32.totalorder %s5819_s26, %s5819_s26 }
 0x247   :  { %3756 = vst [vmem:[#allocation14 + $0x8] sm:$0x77] %v3752_v48  ;;  %p4543_p0 = scmp.ne.s32.totalorder %s5819_s26, %s4542_s2  ;;  %p4548_p2 = scmp.lt.s32.totalorder %s4542_s2, %s4542_s2 }
 0x249   :  { %p4549_p3 = por %p4548_p2, %p4547_p1 }
 0x24b   :  { %p4550_p4 = pnand %p4549_p3, %p4543_p0 }
 0x24d   :  { %4553 = shalt.err (!%p4550_p4)
}
 0x24e   :  { %s4554_s15 = scalar_lea.hbm %s5863_s7, 256 }
 0x24f   :  { %p4555_p5 = scmp.ne.s32.totalorder %s5863_s7, %s4554_s15  ;;  %p4558_p6 = scmp.lt.u32.totalorder %s4554_s15, %s5863_s7 }
 0x251   :  { %p4560_p7 = pnand %p4558_p6, %p4555_p5 }
 0x253   :  { %4563 = shalt.err (!%p4560_p7)
}
 0x254   :  { %3780 = dma.vmem_to_hbm [thread:$0]  %s5819_s26, 256, %s5863_s7, [#allocation15], %s4578_s1, %s4578_s1, %s4579_s23  }
 0x255   :  { %4572 = dma.done.wait [#allocation4], 256  }
 0x256   :  { %4573 = vsyncadd [#allocation4], 4294967040 }
 0x257   :  { %4574 = dma.done.wait [#allocation15], 256  }
 0x258   :  { %4575 = vsyncadd [#allocation15], 4294967040 }
 0x259   :  { %3787 = vsyncpa [#allocation3], 1 }
 0x25a   :  { %3788 = vsyncpa [#allocation6], 1 }
 0x25b   :  { %3789 = vsyncpa [#allocation9], 1 }
 0x25c   :  { %3790 = vsyncpa [#allocation12], 1 }
 0x25d   :  { %3791 = vsyncpa [#allocation4], 1 }
 0x25e   :  { %3792 = vsyncpa [#allocation15], 1 }

// kernel: smplh_forward.3
= control target key start
LH: loop header
LB: loop body
LE: loop exit
PB: predicated region body
PF: predicated region fallthrough
CT: control target
= control target key end

     0   :  { %vm26_vm0 = vcmask 64512   ;;  %v960_v2 = vmov 0.0   ;;  %v961_v10 = vmov 1   ;;  %v962_v11 = vmov 0   ;;  %s1161_s1 = inlined_call_operand.vmem [shape: f32[8,256], index: 1, kind: input, shape index: {}]   ;;  %s1162_s0 = inlined_call_operand.vmem [shape: f32[32,8], index: 0, kind: input, shape index: {}]   ;;  %s1163_s3 = inlined_call_operand.vmem [shape: f32[2,3], index: 3, kind: input, shape index: {}]   ;;  %s1164_s2 = inlined_call_operand.vmem [shape: f32[2,3,256], index: 2, kind: input, shape index: {}]   ;;  %s1165_s4 = inlined_call_operand.vmem [shape: f32[2,3,256], index: 4, kind: output, shape index: {}]  }
   0x1   :  { %v22_v0 = vld [vmem:[%s1161_s1 + $0x8] sm:$0xff]  ;;  %v21_v1 = vld [vmem:[%s1161_s1] sm:$0xff]  ;;  %420 = vmatprep.mubr.f32.mxu0 %v960_v2  ;;  %105 = vmatprep.mubr.f32.mxu1 %v960_v2  ;;  %v19_v8 = vld [vmem:[%s1162_s0 + $0x10] sm:$0xff]  ;;  %v963_v38 = vmov 2   ;;  %v652_v45 = vlaneseq  ;;  %vm774_vm1 = vcmask 1040384   ;;  %vm777_vm2 = vcmask 1041408  }
   0x2   :  { %v17_v3 = vld [vmem:[%s1162_s0] sm:$0xff]  ;;  %v39_v4 = vand.u32 4294901760, %v22_v0  ;;  %v1000_v5 = vand.u32 4294901760, %v21_v1  ;;  %v18_v7 = vld [vmem:[%s1162_s0 + $0x8] sm:$0xff]  ;;  %v20_v9 = vld [vmem:[%s1162_s0 + $0x18] sm:$0xff]  ;;  %957 = vset.pattern.permute.xlu0 %v961_v10  ;;  %959 = vset.pattern.permute.xlu1 %v962_v11  ;;  %v34_v14 = vsel %vm26_vm0, %v19_v8, 0 }
   0x3   :  { %v28_v6 = vsel %vm26_vm0, %v17_v3, 0  ;;  %v31_v13 = vsel %vm26_vm0, %v18_v7, 0  ;;  %v37_v15 = vsel %vm26_vm0, %v20_v9, 0  ;;  %v25_v16 = vld [vmem:[%s1163_s3] sm:$0x3]  ;;  %v1023_v20 = vand.u32 4294901760, %v34_v14 }
   0x4   :  { %v1012_v12 = vand.u32 4294901760, %v28_v6  ;;  %355 = vmatprep.subr.mxu0 %v39_v4  ;;  %v157_v17 = vsub.f32 %v21_v1, %v1000_v5  ;;  %40 = vmatprep.subr.mxu1 %v39_v4  ;;  %v151_v18 = vsub.f32 %v22_v0, %v39_v4  ;;  %v1021_v19 = vand.u32 4294901760, %v31_v13  ;;  %v23_v49 = vld [vmem:[%s1164_s2] sm:$0x77]  ;;  %v24_v1 = vld [vmem:[%s1164_s2 + $0x8] sm:$0x77] }
   0x5   :  { %357 = vmatpush1.msra.mxu0 %v1000_v5  ;;  %42 = vmatpush1.msra.mxu1 %v1000_v5  ;;  %v1030_v22 = vand.u32 4294901760, %v37_v15  ;;  %v1036_v26 = vsub.f32 %v34_v14, %v1023_v20  ;;  %v653_v46 = vshrl.u32 %v652_v45, 7 }
   0x6   :  { %v1027_v21 = vsub.f32 %v28_v6, %v1012_v12  ;;  %v152_v23 = vand.u32 4294901760, %v151_v18  ;;  %v158_v24 = vand.u32 4294901760, %v157_v17  ;;  %v1033_v25 = vsub.f32 %v31_v13, %v1021_v19  ;;  %720 = vperm.xlu0 %957, %v25_v16   ;;  %714 = vperm.xlu1 %959, %v25_v16  }
   0x7   :  { %v130_v32 = vand.u32 4294901760, %v1036_v26  ;;  %v1043_v33 = vsub.f32 %v37_v15, %v1030_v22  ;;  %v666_v47 = vsub.s32 1, %v653_v46  ;;  %v670_v50 = vsub.s32 5, %v653_v46 }
   0x8   :  { %v108_v27 = vand.u32 4294901760, %v1027_v21  ;;  %v153_v28 = vsub.f32 %v151_v18, %v152_v23  ;;  %460 = vmatprep.subr.mxu0 %v152_v23  ;;  %v159_v29 = vsub.f32 %v157_v17, %v158_v24  ;;  %v119_v30 = vand.u32 4294901760, %v1033_v25 }
   0x9   :  { %v131_v40 = vsub.f32 %v1036_v26, %v130_v32  ;;  %v141_v41 = vand.u32 4294901760, %v1043_v33  ;;  %v654_v52 = vsub.s32 0, %v653_v46  ;;  %v686_v53 = vsub.s32 2, %v653_v46 }
   0xa   :  { %424 = vmatmul.mubr.f32.vlgmr.msra.gmra.mrb[0].mxu0 %v108_v27  ;;  %v109_v31 = vsub.f32 %v1027_v21, %v108_v27  ;;  %v154_v34 = vand.u32 4294901760, %v153_v28  ;;  %v160_v35 = vand.u32 4294901760, %v159_v29  ;;  %v120_v36 = vsub.f32 %v1033_v25, %v119_v30  ;;  %958 = vset.pattern.permute.xlu0 %v963_v38 }
   0xb   :  { %429 = vmatprep.mubr.f32.mxu0 %v960_v2  ;;  %464 = vmatpush1.msra.mxu0 %v158_v24  ;;  %v132_v42 = vand.u32 4294901760, %v131_v40  ;;  %v142_v43 = vsub.f32 %v1043_v33, %v141_v41  ;;  %v667_v54 = vrot.slane %v23_v49, %v666_v47  ;;  %v658_v55 = vsub.s32 4, %v653_v46 }
   0xc   :  { %v110_v37 = vand.u32 4294901760, %v109_v31  ;;  %557 = vmatprep.subr.mxu0 %v39_v4  ;;  %155 = vmatprep.subr.mxu1 %v154_v34  ;;  %v121_v39 = vand.u32 4294901760, %v120_v36  ;;  %v690_v56 = vsub.s32 6, %v653_v46  ;;  %v671_v59 = vrot.slane %v23_v49, %v670_v50 }
   0xd   :  { %757 = vperm.xlu0 %958, %v25_v16   ;;  %v143_v44 = vand.u32 4294901760, %v142_v43  ;;  %v655_v61 = vrot.slane %v23_v49, %v654_v52  ;;  %v687_v62 = vrot.slane %v23_v49, %v686_v53  ;;  %v659_v4 = vrot.slane %v23_v49, %v658_v55 }
   0xe   :  { %111 = vmatmul.mubr.f32.vlgmr.msra.gmra.mrb[0].mxu1 %v110_v37  ;;  %433 = vmatmul.mubr.f32.gmra.mrb[2].mxu0 %v119_v30  ;;  %v1102_v10 = vrot.slane %v24_v1, %v654_v52  ;;  %v1104_v11 = vrot.slane %v24_v1, %v666_v47  ;;  %v800_v24 = vrot.slane %v24_v1, %v670_v50 }
   0xf   :  { %161 = vmatpush1.msra.mxu1 %v160_v35  ;;  %116 = vmatprep.mubr.f32.mxu1 %v960_v2  ;;  %v820_v29 = vrot.slane %v24_v1, %v690_v56 }
  0x10   :  { %438 = vmatprep.mubr.f32.mxu0 %v960_v2  ;;  %255 = vmatprep.subr.mxu1 %v151_v18 }
  0x12   :  { %122 = vmatmul.mubr.f32.gmra.mrb[2].mxu1 %v121_v39  ;;  %442 = vmatmul.mubr.f32.gmra.mrb[4].mxu0 %v130_v32 }
  0x13   :  { %127 = vmatprep.mubr.f32.mxu1 %v960_v2  ;;  %447 = vmatprep.mubr.f32.mxu0 %v960_v2 }
  0x16   :  { %133 = vmatmul.mubr.f32.gmra.mrb[4].mxu1 %v132_v42  ;;  %451 = vmatmul.mubr.f32.gmra.mrb[6].mxu0 %v141_v41 }
  0x17   :  { %138 = vmatprep.mubr.f32.mxu1 %v960_v2  ;;  %527 = vmatprep.mubr.f32.mxu0 %v960_v2 }
  0x1a   :  { %144 = vmatmul.mubr.f32.gmra.mrb[6].mxu1 %v143_v44  ;;  %529 = vmatmul.mubr.f32.vlgmr.msra.gmra.mrb[0].mxu0 %v1012_v12 }
  0x1b   :  { %224 = vmatprep.mubr.f32.mxu1 %v960_v2  ;;  %534 = vmatprep.mubr.f32.mxu0 %v960_v2 }
  0x1c   :  { %559 = vmatpush1.msra.mxu0 %v1000_v5  ;;  %v691_v5 = vrot.slane %v23_v49, %v690_v56 }
  0x1e   :  { %226 = vmatmul.mubr.f32.vlgmr.msra.gmra.mrb[0].mxu1 %v1012_v12  ;;  %536 = vmatmul.mubr.f32.gmra.mrb[2].mxu0 %v1021_v19 }
  0x1f   :  { %258 = vmatpush1.msra.mxu1 %v157_v17  ;;  %231 = vmatprep.mubr.f32.mxu1 %v960_v2 }
  0x20   :  { %541 = vmatprep.mubr.f32.mxu0 %v960_v2 }
  0x22   :  { %233 = vmatmul.mubr.f32.gmra.mrb[2].mxu1 %v1021_v19  ;;  %543 = vmatmul.mubr.f32.gmra.mrb[4].mxu0 %v1023_v20 }
  0x23   :  { %238 = vmatprep.mubr.f32.mxu1 %v960_v2  ;;  %548 = vmatprep.mubr.f32.mxu0 %v960_v2 }
  0x26   :  { %240 = vmatmul.mubr.f32.gmra.mrb[4].mxu1 %v1023_v20  ;;  %550 = vmatmul.mubr.f32.gmra.mrb[6].mxu0 %v1030_v22 }
  0x27   :  { %245 = vmatprep.mubr.f32.mxu1 %v960_v2  ;;  %622 = vmatprep.mubr.f32.mxu0 %v960_v2 }
  0x2a   :  { %247 = vmatmul.mubr.f32.gmra.mrb[6].mxu1 %v1030_v22  ;;  %624 = vmatmul.mubr.f32.vlgmr.msra.gmra.mrb[0].mxu0 %v1012_v12 }
  0x2b   :  { %321 = vmatprep.mubr.f32.mxu1 %v960_v2  ;;  %629 = vmatprep.mubr.f32.mxu0 %v960_v2 }
  0x2e   :  { %324 = vmatmul.mubr.f32.vlgmr.msra.gmra.mrb[0].mxu1 %v1027_v21  ;;  %631 = vmatmul.mubr.f32.gmra.mrb[2].mxu0 %v1021_v19  ;;  %v1112_v21 = vrot.slane %v24_v1, %v658_v55 }
  0x2f   :  { %329 = vmatprep.mubr.f32.mxu1 %v960_v2  ;;  %636 = vmatprep.mubr.f32.mxu0 %v960_v2 }
  0x32   :  { %332 = vmatmul.mubr.f32.gmra.mrb[2].mxu1 %v1033_v25  ;;  %638 = vmatmul.mubr.f32.gmra.mrb[4].mxu0 %v1023_v20  ;;  %v816_v20 = vrot.slane %v24_v1, %v686_v53 }
  0x33   :  { %337 = vmatprep.mubr.f32.mxu1 %v960_v2  ;;  %643 = vmatprep.mubr.f32.mxu0 %v960_v2 }
  0x36   :  { %340 = vmatmul.mubr.f32.gmra.mrb[4].mxu1 %v1036_v26  ;;  %645 = vmatmul.mubr.f32.gmra.mrb[6].mxu0 %v1030_v22 }
  0x37   :  { %345 = vmatprep.mubr.f32.mxu1 %v960_v2 }
  0x3a   :  { %348 = vmatmul.mubr.f32.gmra.mrb[6].mxu1 %v1043_v33 }
  0x85   :  { %v1099_v6 = vpop.permute.xlu0 %720  ;;  %v1116_v26 = vpop.permute.xlu1 %714 }
  0x86   :  { %v722_v30 = vrot.slane %v1099_v6, 4  ;;  %v845_v31 = vrot.slane %v1099_v6, 5  ;;  %v841_v32 = vrot.slane %v1116_v26, 1 }
  0xfd   :  { %v625_v48 = vpop.f32.mrb[0].mxu0 }
  0xfe   :  { %v627_v51 = vpop.f32.mrb[1].mxu0 }
 0x101   :  { %v325_v57 = vpop.f32.mrb[0].mxu1  ;;  %v632_v58 = vpop.f32.mrb[2].mxu0 }
 0x102   :  { %v1091_v60 = vadd.f32 %v625_v48, %v325_v57  ;;  %v327_v63 = vpop.f32.mrb[1].mxu1  ;;  %v634_v0 = vpop.f32.mrb[3].mxu0 }
 0x103   :  { %v1096_v2 = vadd.f32 %v627_v51, %v327_v63 }
 0x104   :  { %v674_v3 = vmul.f32 %v1091_v60, %v667_v54  ;;  %v662_v12 = vmul.f32 %v1091_v60, %v655_v61  ;;  %v694_v14 = vmul.f32 %v1091_v60, %v687_v62  ;;  %v706_v41 = vrot.slane %v1091_v60, 3 }
 0x105   :  { %v675_v7 = vmul.f32 %v1096_v2, %v671_v59  ;;  %v333_v8 = vpop.f32.mrb[2].mxu1  ;;  %v639_v9 = vpop.f32.mrb[4].mxu0  ;;  %v663_v22 = vmul.f32 %v1096_v2, %v659_v4  ;;  %v695_v23 = vmul.f32 %v1096_v2, %v691_v5  ;;  %v707_v42 = vrot.slane %v1096_v2, 3 }
 0x106   :  { %v678_v13 = vrot.slane %v674_v3, 1  ;;  %v1108_v15 = vadd.f32 %v632_v58, %v333_v8  ;;  %v335_v16 = vpop.f32.mrb[3].mxu1  ;;  %v641_v17 = vpop.f32.mrb[5].mxu0  ;;  %v698_v33 = vrot.slane %v694_v14, 2 }
 0x107   :  { %v679_v18 = vrot.slane %v675_v7, 1  ;;  %v1110_v19 = vadd.f32 %v634_v0, %v335_v16  ;;  %v699_v43 = vrot.slane %v695_v23, 2 }
 0x108   :  { %v682_v25 = vadd.f32 %v678_v13, %v662_v12  ;;  %v728_v34 = vmul.f32 %v1108_v15, %v667_v54  ;;  %v726_v47 = vmul.f32 %v1108_v15, %v655_v61  ;;  %v738_v51 = vmul.f32 %v1108_v15, %v687_v62 }
 0x109   :  { %v341_v27 = vpop.f32.mrb[4].mxu1  ;;  %v646_v28 = vpop.f32.mrb[6].mxu0  ;;  %v683_v38 = vadd.f32 %v679_v18, %v663_v22  ;;  %v729_v39 = vmul.f32 %v1110_v19, %v671_v59  ;;  %v727_v57 = vmul.f32 %v1110_v19, %v659_v4  ;;  %v739_v1 = vmul.f32 %v1110_v19, %v691_v5 }
 0x10a   :  { %v917_v35 = vadd.f32 %v639_v9, %v341_v27  ;;  %v343_v36 = vpop.f32.mrb[5].mxu1  ;;  %v648_v37 = vpop.f32.mrb[7].mxu0  ;;  %v702_v46 = vadd.f32 %v698_v33, %v682_v25  ;;  %v732_v52 = vrot.slane %v728_v34, 1  ;;  %v742_v23 = vrot.slane %v738_v51, 2 }
 0x10b   :  { %v918_v40 = vadd.f32 %v641_v17, %v343_v36  ;;  %v703_v55 = vadd.f32 %v699_v43, %v683_v38  ;;  %v733_v58 = vrot.slane %v729_v39, 1  ;;  %v743_v25 = vrot.slane %v739_v1, 2 }
 0x10c   :  { %v803_v44 = vmul.f32 %v917_v35, %v1104_v11  ;;  %v823_v45 = vmul.f32 %v917_v35, %v816_v20  ;;  %v791_v53 = vmul.f32 %v917_v35, %v1102_v10  ;;  %v710_v0 = vadd.f32 %v706_v41, %v702_v46 }
 0x10d   :  { %v804_v48 = vmul.f32 %v918_v40, %v800_v24  ;;  %v824_v49 = vmul.f32 %v918_v40, %v820_v29  ;;  %v349_v50 = vpop.f32.mrb[6].mxu1  ;;  %v792_v59 = vmul.f32 %v918_v40, %v1112_v21  ;;  %v711_v8 = vadd.f32 %v707_v42, %v703_v55 }
 0x10e   :  { %v807_v54 = vrot.slane %v803_v44, 1  ;;  %v351_v56 = vpop.f32.mrb[7].mxu1  ;;  %v827_v63 = vrot.slane %v823_v45, 2  ;;  %v919_v62 = vadd.f32 %v646_v28, %v349_v50  ;;  %v835_v12 = vrot.slane %v917_v35, 3  ;;  %v758_v28 = vpop.permute.xlu0 %757 }
 0x10f   :  { %v808_v60 = vrot.slane %v804_v48, 1  ;;  %v828_v2 = vrot.slane %v824_v49, 2  ;;  %v920_v7 = vadd.f32 %v648_v37, %v351_v56  ;;  %v736_v13 = vadd.f32 %v732_v52, %v726_v47 }
 0x110   :  { %v811_v61 = vadd.f32 %v807_v54, %v791_v53  ;;  %v836_v16 = vrot.slane %v918_v40, 3  ;;  %v851_v4 = vmul.f32 %v919_v62, %v1104_v11  ;;  %v737_v17 = vadd.f32 %v733_v58, %v727_v57 }
 0x111   :  { %v812_v3 = vadd.f32 %v808_v60, %v792_v59  ;;  %v861_v18 = vmul.f32 %v919_v62, %v816_v20  ;;  %v852_v22 = vmul.f32 %v920_v7, %v800_v24  ;;  %v862_v34 = vmul.f32 %v920_v7, %v820_v29 }
 0x112   :  { %v831_v9 = vadd.f32 %v827_v63, %v811_v61  ;;  %v855_v33 = vrot.slane %v851_v4, 1  ;;  %v849_v36 = vmul.f32 %v919_v62, %v1102_v10  ;;  %v746_v35 = vadd.f32 %v742_v23, %v736_v13 }
 0x113   :  { %v832_v14 = vadd.f32 %v828_v2, %v812_v3  ;;  %v856_v37 = vrot.slane %v852_v22, 1  ;;  %v879_v38 = vrot.slane %v758_v28, 1  ;;  %v724_v39 = vadd.f32 %v722_v30, %v710_v0 }
 0x114   :  { %v839_v27 = vadd.f32 %v835_v12, %v831_v9  ;;  %v725_v40 = vadd.f32 %v722_v30, %v711_v8  ;;  %v850_v11 = vmul.f32 %v920_v7, %v1112_v21  ;;  %v747_v41 = vadd.f32 %v743_v25, %v737_v17 }
 0x115   :  { %v840_v5 = vadd.f32 %v836_v16, %v832_v14  ;;  %v865_v42 = vrot.slane %v861_v18, 2  ;;  %v750_v20 = vrot.slane %v1108_v15, 3  ;;  %v751_v24 = vrot.slane %v1110_v19, 3 }
 0x116   :  { %v859_v43 = vadd.f32 %v855_v33, %v849_v36  ;;  %v847_v29 = vadd.f32 %v845_v31, %v839_v27  ;;  %v866_v44 = vrot.slane %v862_v34, 2  ;;  %v860_v45 = vadd.f32 %v856_v37, %v850_v11 }
 0x117   :  { %v848_v10 = vadd.f32 %v845_v31, %v840_v5  ;;  %v754_v46 = vadd.f32 %v750_v20, %v746_v35  ;;  %v755_v47 = vadd.f32 %v751_v24, %v747_v41  ;;  %v873_v48 = vrot.slane %v919_v62, 3 }
 0x118   :  { %v869_v30 = vadd.f32 %v865_v42, %v859_v43  ;;  %v764_v21 = vrot.slane %v724_v39, 3  ;;  %v765_v49 = vrot.slane %v725_v40, 3  ;;  %v870_v50 = vadd.f32 %v866_v44, %v860_v45 }
 0x119   :  { %v874_v51 = vrot.slane %v920_v7, 3  ;;  %v760_v15 = vadd.f32 %v758_v28, %v754_v46  ;;  %v761_v19 = vadd.f32 %v758_v28, %v755_v47  ;;  %v885_v53 = vrot.slane %v847_v29, 3 }
 0x11a   :  { %v877_v52 = vadd.f32 %v873_v48, %v869_v30  ;;  %v717_v54 = vadd.f32 %v1116_v26, %v710_v0  ;;  %v718_v6 = vadd.f32 %v1116_v26, %v711_v8  ;;  %v886_v55 = vrot.slane %v848_v10, 3 }
 0x11b   :  { %v878_v31 = vadd.f32 %v874_v51, %v870_v50  ;;  %v770_v56 = vrot.slane %v760_v15, 6  ;;  %v771_v57 = vrot.slane %v761_v19, 6  ;;  %v843_v63 = vadd.f32 %v841_v32, %v839_v27 }
 0x11c   :  { %v881_v58 = vadd.f32 %v879_v38, %v877_v52  ;;  %v775_v59 = vsel %vm774_vm1, %v717_v54, %v764_v21  ;;  %v776_v60 = vsel %vm774_vm1, %v718_v6, %v765_v49  ;;  %v844_v1 = vadd.f32 %v841_v32, %v840_v5 }
 0x11d   :  { %v882_v61 = vadd.f32 %v879_v38, %v878_v31  ;;  %v778_v0 = vsel %vm777_vm2, %v775_v59, %v770_v56  ;;  %v779_v2 = vsel %vm777_vm2, %v776_v60, %v771_v57  ;;  %v895_v62 = vsel %vm774_vm1, %v843_v63, %v885_v53 }
 0x11e   :  { %v891_v3 = vrot.slane %v881_v58, 6  ;;  %v903_v8 = vcombine.low %v778_v0, %v779_v2  ;;  %v896_v9 = vsel %vm774_vm1, %v844_v1, %v886_v55 }
 0x11f   :  { %v892_v7 = vrot.slane %v882_v61, 6 }
 0x120   :  { %v897_v12 = vsel %vm777_vm2, %v895_v62, %v891_v3  ;;  %907 = vst [vmem:[%s1165_s4] sm:$0x77] %v903_v8 }
 0x121   :  { %v898_v13 = vsel %vm777_vm2, %v896_v9, %v892_v7 }
 0x122   :  { %v904_v26 = vcombine.low %v897_v12, %v898_v13 }
 0x124   :  { %908 = vst [vmem:[%s1165_s4 + $0x8] sm:$0x77] %v904_v26 }

</bundles_post_ra>
